<compile_context>
chip_gen: v6e
topology: v6e:2x2x1
jax: 0.10.0
libtpu: 0.0.40
codegen_flags: <defaults>
</compile_context>

<pallas_src>
import math
from functools import partial

import jax
import jax.numpy as jnp
from jax.experimental import pallas as pl
from jax.experimental.pallas import tpu as pltpu

LN_EPS = 1e-5  # nn.LayerNorm default


def _round_up(v, m):
    return ((v + m - 1) // m) * m


def _layer_norm(x, g, b):
    mu = jnp.mean(x, axis=-1, keepdims=True)
    var = jnp.mean((x - mu) ** 2, axis=-1, keepdims=True)
    return (x - mu) * jax.lax.rsqrt(var + LN_EPS) * g + b


# --------------------------------------------------------------------------
# Fused model kernel: L post-LN encoder layers + mean over batch + dense head.
# Activation layout: (N*S, E), sample n occupies rows [n*S, (n+1)*S).
# Assumes S is a multiple of 8 (sublane tile) so (N*S, ·) <-> (N, S, ·)
# reshapes are tile-aligned.
# --------------------------------------------------------------------------
def _fused_model_kernel(num_layers, num_heads, N, S, E, FF, n_dense,
                        in_pad, out_pad,
                        x_ref, wqkv_ref, wo_ref, w1_ref, w2_ref, slab_ref,
                        dense_ref, o_ref):
    H = num_heads
    Dh = E // H
    scale = 1.0 / math.sqrt(Dh)

    x = x_ref[...]                                    # (N*S, E) float32

    # TODO(synk): nn.Dropout(p=0.1) layers are treated as identity (eval mode).
    for l in range(num_layers):                       # static unroll (L small)
        # --- lane-0-aligned bias / LayerNorm vectors, one per sublane row ---
        bqkv = slab_ref[l, 0:1, 0:3 * E]              # (1, 3E)
        bo   = slab_ref[l, 1:2, 0:E]
        b1   = slab_ref[l, 2:3, 0:FF]
        b2   = slab_ref[l, 3:4, 0:E]
        g1   = slab_ref[l, 4:5, 0:E]
        be1  = slab_ref[l, 5:6, 0:E]
        g2   = slab_ref[l, 6:7, 0:E]
        be2  = slab_ref[l, 7:8, 0:E]

        # --- fused QKV projection for all N*S rows in one MXU matmul ---
        qkv = jnp.dot(x, wqkv_ref[l],
                      preferred_element_type=jnp.float32) + bqkv   # (N*S, 3E)
        qkv3 = qkv.reshape(N, S, 3 * E)               # leading-dim split only

        # --- attention: batched over N, static loop over heads, no concats ---
        attn = None
        for h in range(H):
            c = h * Dh
            qh = qkv3[:, :, c:c + Dh]                              # (N, S, Dh)
            kh = qkv3[:, :, E + c:E + c + Dh]
            vh = qkv3[:, :, 2 * E + c:2 * E + c + Dh]

            s = jnp.einsum('nqd,nkd->nqk', qh, kh,
                           preferred_element_type=jnp.float32) * scale
            s = s - jnp.max(s, axis=-1, keepdims=True)
            p = jnp.exp(s)
            p = p / jnp.sum(p, axis=-1, keepdims=True)
            ctx = jnp.einsum('nqk,nkd->nqd', p, vh,
                             preferred_element_type=jnp.float32)   # (N, S, Dh)

            # head merge folded into the output projection:
            # attn += ctx_h @ W_o[h*Dh:(h+1)*Dh, :]   (sublane-aligned slice)
            part = jnp.dot(ctx.reshape(N * S, Dh), wo_ref[l, c:c + Dh, :],
                           preferred_element_type=jnp.float32)     # (N*S, E)
            attn = part if attn is None else attn + part
        attn = attn + bo

        # --- post-LN residual blocks ---
        x = _layer_norm(x + attn, g1, be1)
        hdn = jnp.maximum(
            jnp.dot(x, w1_ref[l], preferred_element_type=jnp.float32) + b1, 0.0)
        ff = jnp.dot(hdn, w2_ref[l], preferred_element_type=jnp.float32) + b2
        x = _layer_norm(x + ff, g2, be2)

    # PyTorch: x.mean(dim=1) on (S, N, E) output == mean over batch dim N.
    xm = x[0:S, :]
    for n in range(1, N):
        xm = xm + x[n * S:(n + 1) * S, :]
    xm = xm * (1.0 / N)

    # Dense head: weights zero-padded to (in_pad, out_pad), bias in row in_pad.
    in_dims = [E] + [out_pad] * (n_dense - 1)
    for i in range(n_dense):
        w = dense_ref[i, 0:in_dims[i], :]             # (in, out_pad)
        b = dense_ref[i, in_pad:in_pad + 1, :]        # (1, out_pad)
        xm = jnp.dot(xm, w, preferred_element_type=jnp.float32) + b

    o_ref[...] = xm.astype(o_ref.dtype)               # lane-dense (S, out_pad)


# --------------------------------------------------------------------------
# Parameter packing (done once, outside the kernel).
# --------------------------------------------------------------------------
def pack_params(layers, dense, num_classes):
    E = layers[0]["wq"].shape[0]
    FF = layers[0]["w1"].shape[1]
    P = _round_up(max(3 * E, FF), 128)                # slab lane width

    def slab_row(v):                                  # v: (1, w) -> (P,)
        return jnp.zeros((P,), jnp.float32).at[:v.shape[1]].set(v[0])

    slab = []
    for p in layers:
        rows = [jnp.concatenate([p["bq"], p["bk"], p["bv"]], axis=1),  # bqkv
                p["bo"], p["b1"], p["b2"], p["g1"], p["be1"], p["g2"], p["be2"]]
        slab.append(jnp.stack([slab_row(r) for r in rows]))           # (8, P)

    packed = {
        "wqkv": jnp.stack(
            [jnp.concatenate([p["wq"], p["wk"], p["wv"]], axis=1) for p in layers]),
        "wo": jnp.stack([p["wo"] for p in layers]),
        "w1": jnp.stack([p["w1"] for p in layers]),
        "w2": jnp.stack([p["w2"] for p in layers]),
        "slab": jnp.stack(slab),                                      # (L, 8, P)
    }

    out_pad = _round_up(max(num_classes, 32), 128)
    in_pad = max(E, out_pad)
    n_dense = len(dense)
    dp = jnp.zeros((n_dense, in_pad + 8, out_pad), jnp.float32)
    for i, (w, b) in enumerate(dense):
        in_f, out_f = w.shape
        dp = dp.at[i, 0:in_f, 0:out_f].set(w)
        dp = dp.at[i, in_pad, 0:out_f].set(b[0])
    packed["dense"] = dp
    packed["in_pad"] = in_pad
    packed["out_pad"] = out_pad
    return packed


def vanilla_transformer_forward(x_sne, packed, num_heads, num_classes):
    """x_sne: (S, N, E) float32 (PyTorch batch_first=False layout)."""
    S, N, E = x_sne.shape
    L = packed["wqkv"].shape[0]
    FF = packed["w1"].shape[2]
    n_dense = packed["dense"].shape[0]
    in_pad, out_pad = packed["in_pad"], packed["out_pad"]

    # (S, N, E) -> (N, S, E) -> (N*S, E): sample n occupies rows n*S..(n+1)*S.
    x2 = jnp.transpose(x_sne, (1, 0, 2)).reshape(N * S, E)

    inputs = [x2, packed["wqkv"], packed["wo"], packed["w1"], packed["w2"],
              packed["slab"], packed["dense"]]

    kernel = partial(_fused_model_kernel, L, num_heads, N, S, E, FF, n_dense,
                     in_pad, out_pad)
    out = pl.pallas_call(
        kernel,
        out_shape=jax.ShapeDtypeStruct((S, out_pad), jnp.float32),
        in_specs=[pl.BlockSpec(memory_space=pltpu.MemorySpace.VMEM)
                  for _ in inputs],
        out_specs=pl.BlockSpec(memory_space=pltpu.MemorySpace.VMEM),
    )(*inputs)
    return out[:, :num_classes]


# --------------------------------------------------------------------------
# Parameter construction (xavier_uniform weights, zero biases, LN gamma=1
# beta=0), matching the PyTorch module's init_weights().
# --------------------------------------------------------------------------
def _xavier(key, out_f, in_f):
    limit = math.sqrt(6.0 / (in_f + out_f))
    w = jax.random.uniform(key, (out_f, in_f), jnp.float32, -limit, limit)
    return w.T  # stored transposed: (in, out), kernels compute x @ W


def build_params(key, num_layers, d_model, dim_ff, num_dense_layers, num_classes):
    E, FF = d_model, dim_ff
    layers = []
    for _ in range(num_layers):
        key, *ks = jax.random.split(key, 7)
        layers.append({
            "wq": _xavier(ks[0], E, E),  "bq": jnp.zeros((1, E), jnp.float32),
            "wk": _xavier(ks[1], E, E),  "bk": jnp.zeros((1, E), jnp.float32),
            "wv": _xavier(ks[2], E, E),  "bv": jnp.zeros((1, E), jnp.float32),
            "wo": _xavier(ks[3], E, E),  "bo": jnp.zeros((1, E), jnp.float32),
            "w1": _xavier(ks[4], FF, E), "b1": jnp.zeros((1, FF), jnp.float32),
            "w2": _xavier(ks[5], E, FF), "b2": jnp.zeros((1, E), jnp.float32),
            "g1": jnp.ones((1, E), jnp.float32), "be1": jnp.zeros((1, E), jnp.float32),
            "g2": jnp.ones((1, E), jnp.float32), "be2": jnp.zeros((1, E), jnp.float32),
        })
    dense = []
    in_f = E
    for l in range(num_dense_layers):
        out_f = num_classes if l == num_dense_layers - 1 else 32
        key, kw = jax.random.split(key)
        dense.append((_xavier(kw, out_f, in_f), jnp.zeros((1, out_f), jnp.float32)))
        in_f = out_f
    return layers, dense


# --------------------------------------------------------------------------
# Pure-JAX reference for validation.
# --------------------------------------------------------------------------
def ref_forward(x_sne, layers, dense, num_heads):
    x = jnp.transpose(x_sne, (1, 0, 2))            # (N, S, E)
    N, S, E = x.shape
    Dh = E // num_heads
    for p in layers:
        q = (x @ p["wq"] + p["bq"][0]).reshape(N, S, num_heads, Dh)
        k = (x @ p["wk"] + p["bk"][0]).reshape(N, S, num_heads, Dh)
        v = (x @ p["wv"] + p["bv"][0]).reshape(N, S, num_heads, Dh)
        s = jnp.einsum("nqhd,nkhd->nhqk", q, k) / math.sqrt(Dh)
        a = jax.nn.softmax(s, axis=-1)
        o = jnp.einsum("nhqk,nkhd->nqhd", a, v).reshape(N, S, E)
        o = o @ p["wo"] + p["bo"][0]
        x = _layer_norm(x + o, p["g1"][0], p["be1"][0])
        ff = jax.nn.relu(x @ p["w1"] + p["b1"][0]) @ p["w2"] + p["b2"][0]
        x = _layer_norm(x + ff, p["g2"][0], p["be2"][0])
    xm = jnp.mean(x, axis=0)
    for w, b in dense:
        xm = xm @ w + b[0]
    return xm


if __name__ == "__main__":
    # small config consistent with the module
    num_layers, num_heads, d_model = 2, 4, 32
    dim_feedforward, num_dense_layers, num_classes = 64, 2, 10
    S, N = 8, 2                                     # seq, batch

    key = jax.random.PRNGKey(0)
    k_in, k_params = jax.random.split(key)
    x = jax.random.normal(k_in, (S, N, d_model), jnp.float32)   # PyTorch (S, N, E)

    layers, dense = build_params(k_params, num_layers, d_model,
                                 dim_feedforward, num_dense_layers, num_classes)
    packed = pack_params(layers, dense, num_classes)

    out = vanilla_transformer_forward(x, packed, num_heads, num_classes)
    out = jax.block_until_ready(out)

    ref = ref_forward(x, layers, dense, num_heads)
    assert out.shape == (S, num_classes), out.shape
    assert jnp.allclose(out, ref, atol=1e-4, rtol=1e-4), \
        float(jnp.max(jnp.abs(out - ref)))
    print("KERNEL_OK")
</pallas_src>

<mosaic_0001>
module attributes {stable_mosaic.version = 11 : i64} {
  func.func @_fused_model_kernel(%arg0: memref<16x32xf32, #tpu.memory_space<vmem>>, %arg1: memref<2x32x96xf32, #tpu.memory_space<vmem>>, %arg2: memref<2x32x32xf32, #tpu.memory_space<vmem>>, %arg3: memref<2x32x64xf32, #tpu.memory_space<vmem>>, %arg4: memref<2x64x32xf32, #tpu.memory_space<vmem>>, %arg5: memref<2x8x128xf32, #tpu.memory_space<vmem>>, %arg6: memref<2x136x128xf32, #tpu.memory_space<vmem>>, %arg7: memref<8x128xf32, #tpu.memory_space<vmem>>) attributes {dimension_semantics = [], scalar_prefetch = 0 : i64, scratch_operands = 0 : i64, tpu.core_type = #tpu.core_type<tc>} {
    %c0 = arith.constant 0 : index
    %c0_0 = arith.constant 0 : index
    %0 = vector.load %arg0[%c0, %c0_0] : memref<16x32xf32, #tpu.memory_space<vmem>>, vector<16x32xf32>
    %c0_1 = arith.constant 0 : index
    %c0_2 = arith.constant 0 : index
    %c0_3 = arith.constant 0 : index
    %1 = vector.load %arg5[%c0_1, %c0_2, %c0_3] : memref<2x8x128xf32, #tpu.memory_space<vmem>>, vector<1x1x96xf32>
    %2 = vector.shape_cast %1 : vector<1x1x96xf32> to vector<1x96xf32>
    %c0_4 = arith.constant 0 : index
    %c1 = arith.constant 1 : index
    %c0_5 = arith.constant 0 : index
    %3 = vector.load %arg5[%c0_4, %c1, %c0_5] : memref<2x8x128xf32, #tpu.memory_space<vmem>>, vector<1x1x32xf32>
    %4 = vector.shape_cast %3 : vector<1x1x32xf32> to vector<1x32xf32>
    %c0_6 = arith.constant 0 : index
    %c2 = arith.constant 2 : index
    %c0_7 = arith.constant 0 : index
    %5 = vector.load %arg5[%c0_6, %c2, %c0_7] : memref<2x8x128xf32, #tpu.memory_space<vmem>>, vector<1x1x64xf32>
    %6 = vector.shape_cast %5 : vector<1x1x64xf32> to vector<1x64xf32>
    %c0_8 = arith.constant 0 : index
    %c3 = arith.constant 3 : index
    %c0_9 = arith.constant 0 : index
    %7 = vector.load %arg5[%c0_8, %c3, %c0_9] : memref<2x8x128xf32, #tpu.memory_space<vmem>>, vector<1x1x32xf32>
    %8 = vector.shape_cast %7 : vector<1x1x32xf32> to vector<1x32xf32>
    %c0_10 = arith.constant 0 : index
    %c4 = arith.constant 4 : index
    %c0_11 = arith.constant 0 : index
    %9 = vector.load %arg5[%c0_10, %c4, %c0_11] : memref<2x8x128xf32, #tpu.memory_space<vmem>>, vector<1x1x32xf32>
    %10 = vector.shape_cast %9 : vector<1x1x32xf32> to vector<1x32xf32>
    %c0_12 = arith.constant 0 : index
    %c5 = arith.constant 5 : index
    %c0_13 = arith.constant 0 : index
    %11 = vector.load %arg5[%c0_12, %c5, %c0_13] : memref<2x8x128xf32, #tpu.memory_space<vmem>>, vector<1x1x32xf32>
    %12 = vector.shape_cast %11 : vector<1x1x32xf32> to vector<1x32xf32>
    %c0_14 = arith.constant 0 : index
    %c6 = arith.constant 6 : index
    %c0_15 = arith.constant 0 : index
    %13 = vector.load %arg5[%c0_14, %c6, %c0_15] : memref<2x8x128xf32, #tpu.memory_space<vmem>>, vector<1x1x32xf32>
    %14 = vector.shape_cast %13 : vector<1x1x32xf32> to vector<1x32xf32>
    %c0_16 = arith.constant 0 : index
    %c7 = arith.constant 7 : index
    %c0_17 = arith.constant 0 : index
    %15 = vector.load %arg5[%c0_16, %c7, %c0_17] : memref<2x8x128xf32, #tpu.memory_space<vmem>>, vector<1x1x32xf32>
    %16 = vector.shape_cast %15 : vector<1x1x32xf32> to vector<1x32xf32>
    %c0_18 = arith.constant 0 : index
    %c0_19 = arith.constant 0 : index
    %c0_20 = arith.constant 0 : index
    %17 = vector.load %arg1[%c0_18, %c0_19, %c0_20] : memref<2x32x96xf32, #tpu.memory_space<vmem>>, vector<1x32x96xf32>
    %18 = vector.shape_cast %17 : vector<1x32x96xf32> to vector<32x96xf32>
    %cst = arith.constant dense<0.000000e+00> : vector<16x96xf32>
    %19 = tpu.matmul %0, %18, %cst {dimension_numbers = #tpu.dot_dimension_numbers<[1], [0], [0], [1], [0, 0, 1, 1], [], []>} : vector<16x32xf32>, vector<32x96xf32>, vector<16x96xf32> -> vector<16x96xf32>
    %20 = vector.broadcast %2 : vector<1x96xf32> to vector<16x96xf32>
    %21 = arith.addf %19, %20 : vector<16x96xf32>
    %22 = vector.shape_cast %21 : vector<16x96xf32> to vector<2x8x96xf32>
    %23 = vector.extract_strided_slice %22 {offsets = [0, 0, 0], sizes = [2, 8, 8], strides = [1, 1, 1]} : vector<2x8x96xf32> to vector<2x8x8xf32>
    %24 = vector.extract_strided_slice %22 {offsets = [0, 0, 32], sizes = [2, 8, 8], strides = [1, 1, 1]} : vector<2x8x96xf32> to vector<2x8x8xf32>
    %25 = vector.extract_strided_slice %22 {offsets = [0, 0, 64], sizes = [2, 8, 8], strides = [1, 1, 1]} : vector<2x8x96xf32> to vector<2x8x8xf32>
    "tpu.trace_start"() <{level = 10 : i32, message = "nqd,nkd->nqk"}> : () -> ()
    %cst_21 = arith.constant dense<0.000000e+00> : vector<2x8x8xf32>
    %26 = tpu.matmul %23, %24, %cst_21 {dimension_numbers = #tpu.dot_dimension_numbers<[2], [2], [1], [1], [0, 0, 0, 1, 1, 1], [0], [0]>} : vector<2x8x8xf32>, vector<2x8x8xf32>, vector<2x8x8xf32> -> vector<2x8x8xf32>
    "tpu.trace_stop"() : () -> ()
    %cst_22 = arith.constant 0.353553385 : f32
    %27 = vector.broadcast %cst_22 : f32 to vector<2x8x8xf32>
    %28 = arith.mulf %26, %27 : vector<2x8x8xf32>
    %cst_23 = arith.constant dense<0xFF800000> : vector<2x8xf32>
    %29 = vector.multi_reduction <maximumf>, %28, %cst_23 [2] : vector<2x8x8xf32> to vector<2x8xf32>
    %30 = vector.shape_cast %29 : vector<2x8xf32> to vector<2x8x1xf32>
    %31 = vector.broadcast %30 : vector<2x8x1xf32> to vector<2x8x8xf32>
    %32 = arith.subf %28, %31 : vector<2x8x8xf32>
    %33 = math.exp %32 : vector<2x8x8xf32>
    %cst_24 = arith.constant dense<0.000000e+00> : vector<2x8xf32>
    %34 = vector.multi_reduction <add>, %33, %cst_24 [2] : vector<2x8x8xf32> to vector<2x8xf32>
    %35 = vector.shape_cast %34 : vector<2x8xf32> to vector<2x8x1xf32>
    %36 = vector.broadcast %35 : vector<2x8x1xf32> to vector<2x8x8xf32>
    %37 = arith.divf %33, %36 : vector<2x8x8xf32>
    "tpu.trace_start"() <{level = 10 : i32, message = "nqk,nkd->nqd"}> : () -> ()
    %cst_25 = arith.constant dense<0.000000e+00> : vector<2x8x8xf32>
    %38 = tpu.matmul %37, %25, %cst_25 {dimension_numbers = #tpu.dot_dimension_numbers<[2], [1], [1], [2], [0, 0, 0, 1, 1, 2], [0], [0]>} : vector<2x8x8xf32>, vector<2x8x8xf32>, vector<2x8x8xf32> -> vector<2x8x8xf32>
    "tpu.trace_stop"() : () -> ()
    %39 = vector.shape_cast %38 : vector<2x8x8xf32> to vector<16x8xf32>
    %c0_26 = arith.constant 0 : index
    %c0_27 = arith.constant 0 : index
    %c0_28 = arith.constant 0 : index
    %40 = vector.load %arg2[%c0_26, %c0_27, %c0_28] : memref<2x32x32xf32, #tpu.memory_space<vmem>>, vector<1x8x32xf32>
    %41 = vector.shape_cast %40 : vector<1x8x32xf32> to vector<8x32xf32>
    %cst_29 = arith.constant dense<0.000000e+00> : vector<16x32xf32>
    %42 = tpu.matmul %39, %41, %cst_29 {dimension_numbers = #tpu.dot_dimension_numbers<[1], [0], [0], [1], [0, 0, 1, 1], [], []>} : vector<16x8xf32>, vector<8x32xf32>, vector<16x32xf32> -> vector<16x32xf32>
    %43 = vector.extract_strided_slice %22 {offsets = [0, 0, 8], sizes = [2, 8, 8], strides = [1, 1, 1]} : vector<2x8x96xf32> to vector<2x8x8xf32>
    %44 = vector.extract_strided_slice %22 {offsets = [0, 0, 40], sizes = [2, 8, 8], strides = [1, 1, 1]} : vector<2x8x96xf32> to vector<2x8x8xf32>
    %45 = vector.extract_strided_slice %22 {offsets = [0, 0, 72], sizes = [2, 8, 8], strides = [1, 1, 1]} : vector<2x8x96xf32> to vector<2x8x8xf32>
    "tpu.trace_start"() <{level = 10 : i32, message = "nqd,nkd->nqk"}> : () -> ()
    %cst_30 = arith.constant dense<0.000000e+00> : vector<2x8x8xf32>
    %46 = tpu.matmul %43, %44, %cst_30 {dimension_numbers = #tpu.dot_dimension_numbers<[2], [2], [1], [1], [0, 0, 0, 1, 1, 1], [0], [0]>} : vector<2x8x8xf32>, vector<2x8x8xf32>, vector<2x8x8xf32> -> vector<2x8x8xf32>
    "tpu.trace_stop"() : () -> ()
    %cst_31 = arith.constant 0.353553385 : f32
    %47 = vector.broadcast %cst_31 : f32 to vector<2x8x8xf32>
    %48 = arith.mulf %46, %47 : vector<2x8x8xf32>
    %cst_32 = arith.constant dense<0xFF800000> : vector<2x8xf32>
    %49 = vector.multi_reduction <maximumf>, %48, %cst_32 [2] : vector<2x8x8xf32> to vector<2x8xf32>
    %50 = vector.shape_cast %49 : vector<2x8xf32> to vector<2x8x1xf32>
    %51 = vector.broadcast %50 : vector<2x8x1xf32> to vector<2x8x8xf32>
    %52 = arith.subf %48, %51 : vector<2x8x8xf32>
    %53 = math.exp %52 : vector<2x8x8xf32>
    %cst_33 = arith.constant dense<0.000000e+00> : vector<2x8xf32>
    %54 = vector.multi_reduction <add>, %53, %cst_33 [2] : vector<2x8x8xf32> to vector<2x8xf32>
    %55 = vector.shape_cast %54 : vector<2x8xf32> to vector<2x8x1xf32>
    %56 = vector.broadcast %55 : vector<2x8x1xf32> to vector<2x8x8xf32>
    %57 = arith.divf %53, %56 : vector<2x8x8xf32>
    "tpu.trace_start"() <{level = 10 : i32, message = "nqk,nkd->nqd"}> : () -> ()
    %cst_34 = arith.constant dense<0.000000e+00> : vector<2x8x8xf32>
    %58 = tpu.matmul %57, %45, %cst_34 {dimension_numbers = #tpu.dot_dimension_numbers<[2], [1], [1], [2], [0, 0, 0, 1, 1, 2], [0], [0]>} : vector<2x8x8xf32>, vector<2x8x8xf32>, vector<2x8x8xf32> -> vector<2x8x8xf32>
    "tpu.trace_stop"() : () -> ()
    %59 = vector.shape_cast %58 : vector<2x8x8xf32> to vector<16x8xf32>
    %c0_35 = arith.constant 0 : index
    %c8 = arith.constant 8 : index
    %c0_36 = arith.constant 0 : index
    %60 = vector.load %arg2[%c0_35, %c8, %c0_36] : memref<2x32x32xf32, #tpu.memory_space<vmem>>, vector<1x8x32xf32>
    %61 = vector.shape_cast %60 : vector<1x8x32xf32> to vector<8x32xf32>
    %cst_37 = arith.constant dense<0.000000e+00> : vector<16x32xf32>
    %62 = tpu.matmul %59, %61, %cst_37 {dimension_numbers = #tpu.dot_dimension_numbers<[1], [0], [0], [1], [0, 0, 1, 1], [], []>} : vector<16x8xf32>, vector<8x32xf32>, vector<16x32xf32> -> vector<16x32xf32>
    %63 = arith.addf %42, %62 : vector<16x32xf32>
    %64 = vector.extract_strided_slice %22 {offsets = [0, 0, 16], sizes = [2, 8, 8], strides = [1, 1, 1]} : vector<2x8x96xf32> to vector<2x8x8xf32>
    %65 = vector.extract_strided_slice %22 {offsets = [0, 0, 48], sizes = [2, 8, 8], strides = [1, 1, 1]} : vector<2x8x96xf32> to vector<2x8x8xf32>
    %66 = vector.extract_strided_slice %22 {offsets = [0, 0, 80], sizes = [2, 8, 8], strides = [1, 1, 1]} : vector<2x8x96xf32> to vector<2x8x8xf32>
    "tpu.trace_start"() <{level = 10 : i32, message = "nqd,nkd->nqk"}> : () -> ()
    %cst_38 = arith.constant dense<0.000000e+00> : vector<2x8x8xf32>
    %67 = tpu.matmul %64, %65, %cst_38 {dimension_numbers = #tpu.dot_dimension_numbers<[2], [2], [1], [1], [0, 0, 0, 1, 1, 1], [0], [0]>} : vector<2x8x8xf32>, vector<2x8x8xf32>, vector<2x8x8xf32> -> vector<2x8x8xf32>
    "tpu.trace_stop"() : () -> ()
    %cst_39 = arith.constant 0.353553385 : f32
    %68 = vector.broadcast %cst_39 : f32 to vector<2x8x8xf32>
    %69 = arith.mulf %67, %68 : vector<2x8x8xf32>
    %cst_40 = arith.constant dense<0xFF800000> : vector<2x8xf32>
    %70 = vector.multi_reduction <maximumf>, %69, %cst_40 [2] : vector<2x8x8xf32> to vector<2x8xf32>
    %71 = vector.shape_cast %70 : vector<2x8xf32> to vector<2x8x1xf32>
    %72 = vector.broadcast %71 : vector<2x8x1xf32> to vector<2x8x8xf32>
    %73 = arith.subf %69, %72 : vector<2x8x8xf32>
    %74 = math.exp %73 : vector<2x8x8xf32>
    %cst_41 = arith.constant dense<0.000000e+00> : vector<2x8xf32>
    %75 = vector.multi_reduction <add>, %74, %cst_41 [2] : vector<2x8x8xf32> to vector<2x8xf32>
    %76 = vector.shape_cast %75 : vector<2x8xf32> to vector<2x8x1xf32>
    %77 = vector.broadcast %76 : vector<2x8x1xf32> to vector<2x8x8xf32>
    %78 = arith.divf %74, %77 : vector<2x8x8xf32>
    "tpu.trace_start"() <{level = 10 : i32, message = "nqk,nkd->nqd"}> : () -> ()
    %cst_42 = arith.constant dense<0.000000e+00> : vector<2x8x8xf32>
    %79 = tpu.matmul %78, %66, %cst_42 {dimension_numbers = #tpu.dot_dimension_numbers<[2], [1], [1], [2], [0, 0, 0, 1, 1, 2], [0], [0]>} : vector<2x8x8xf32>, vector<2x8x8xf32>, vector<2x8x8xf32> -> vector<2x8x8xf32>
    "tpu.trace_stop"() : () -> ()
    %80 = vector.shape_cast %79 : vector<2x8x8xf32> to vector<16x8xf32>
    %c0_43 = arith.constant 0 : index
    %c16 = arith.constant 16 : index
    %c0_44 = arith.constant 0 : index
    %81 = vector.load %arg2[%c0_43, %c16, %c0_44] : memref<2x32x32xf32, #tpu.memory_space<vmem>>, vector<1x8x32xf32>
    %82 = vector.shape_cast %81 : vector<1x8x32xf32> to vector<8x32xf32>
    %cst_45 = arith.constant dense<0.000000e+00> : vector<16x32xf32>
    %83 = tpu.matmul %80, %82, %cst_45 {dimension_numbers = #tpu.dot_dimension_numbers<[1], [0], [0], [1], [0, 0, 1, 1], [], []>} : vector<16x8xf32>, vector<8x32xf32>, vector<16x32xf32> -> vector<16x32xf32>
    %84 = arith.addf %63, %83 : vector<16x32xf32>
    %85 = vector.extract_strided_slice %22 {offsets = [0, 0, 24], sizes = [2, 8, 8], strides = [1, 1, 1]} : vector<2x8x96xf32> to vector<2x8x8xf32>
    %86 = vector.extract_strided_slice %22 {offsets = [0, 0, 56], sizes = [2, 8, 8], strides = [1, 1, 1]} : vector<2x8x96xf32> to vector<2x8x8xf32>
    %87 = vector.extract_strided_slice %22 {offsets = [0, 0, 88], sizes = [2, 8, 8], strides = [1, 1, 1]} : vector<2x8x96xf32> to vector<2x8x8xf32>
    "tpu.trace_start"() <{level = 10 : i32, message = "nqd,nkd->nqk"}> : () -> ()
    %cst_46 = arith.constant dense<0.000000e+00> : vector<2x8x8xf32>
    %88 = tpu.matmul %85, %86, %cst_46 {dimension_numbers = #tpu.dot_dimension_numbers<[2], [2], [1], [1], [0, 0, 0, 1, 1, 1], [0], [0]>} : vector<2x8x8xf32>, vector<2x8x8xf32>, vector<2x8x8xf32> -> vector<2x8x8xf32>
    "tpu.trace_stop"() : () -> ()
    %cst_47 = arith.constant 0.353553385 : f32
    %89 = vector.broadcast %cst_47 : f32 to vector<2x8x8xf32>
    %90 = arith.mulf %88, %89 : vector<2x8x8xf32>
    %cst_48 = arith.constant dense<0xFF800000> : vector<2x8xf32>
    %91 = vector.multi_reduction <maximumf>, %90, %cst_48 [2] : vector<2x8x8xf32> to vector<2x8xf32>
    %92 = vector.shape_cast %91 : vector<2x8xf32> to vector<2x8x1xf32>
    %93 = vector.broadcast %92 : vector<2x8x1xf32> to vector<2x8x8xf32>
    %94 = arith.subf %90, %93 : vector<2x8x8xf32>
    %95 = math.exp %94 : vector<2x8x8xf32>
    %cst_49 = arith.constant dense<0.000000e+00> : vector<2x8xf32>
    %96 = vector.multi_reduction <add>, %95, %cst_49 [2] : vector<2x8x8xf32> to vector<2x8xf32>
    %97 = vector.shape_cast %96 : vector<2x8xf32> to vector<2x8x1xf32>
    %98 = vector.broadcast %97 : vector<2x8x1xf32> to vector<2x8x8xf32>
    %99 = arith.divf %95, %98 : vector<2x8x8xf32>
    "tpu.trace_start"() <{level = 10 : i32, message = "nqk,nkd->nqd"}> : () -> ()
    %cst_50 = arith.constant dense<0.000000e+00> : vector<2x8x8xf32>
    %100 = tpu.matmul %99, %87, %cst_50 {dimension_numbers = #tpu.dot_dimension_numbers<[2], [1], [1], [2], [0, 0, 0, 1, 1, 2], [0], [0]>} : vector<2x8x8xf32>, vector<2x8x8xf32>, vector<2x8x8xf32> -> vector<2x8x8xf32>
    "tpu.trace_stop"() : () -> ()
    %101 = vector.shape_cast %100 : vector<2x8x8xf32> to vector<16x8xf32>
    %c0_51 = arith.constant 0 : index
    %c24 = arith.constant 24 : index
    %c0_52 = arith.constant 0 : index
    %102 = vector.load %arg2[%c0_51, %c24, %c0_52] : memref<2x32x32xf32, #tpu.memory_space<vmem>>, vector<1x8x32xf32>
    %103 = vector.shape_cast %102 : vector<1x8x32xf32> to vector<8x32xf32>
    %cst_53 = arith.constant dense<0.000000e+00> : vector<16x32xf32>
    %104 = tpu.matmul %101, %103, %cst_53 {dimension_numbers = #tpu.dot_dimension_numbers<[1], [0], [0], [1], [0, 0, 1, 1], [], []>} : vector<16x8xf32>, vector<8x32xf32>, vector<16x32xf32> -> vector<16x32xf32>
    %105 = arith.addf %84, %104 : vector<16x32xf32>
    %106 = vector.broadcast %4 : vector<1x32xf32> to vector<16x32xf32>
    %107 = arith.addf %105, %106 : vector<16x32xf32>
    %108 = arith.addf %0, %107 : vector<16x32xf32>
    %cst_54 = arith.constant dense<0.000000e+00> : vector<16xf32>
    %109 = vector.multi_reduction <add>, %108, %cst_54 [1] : vector<16x32xf32> to vector<16xf32>
    %110 = vector.shape_cast %109 : vector<16xf32> to vector<16x1xf32>
    %cst_55 = arith.constant 3.200000e+01 : f32
    %111 = vector.broadcast %cst_55 : f32 to vector<16x1xf32>
    %112 = arith.divf %110, %111 : vector<16x1xf32>
    %113 = vector.broadcast %112 : vector<16x1xf32> to vector<16x32xf32>
    %114 = arith.subf %108, %113 : vector<16x32xf32>
    %115 = arith.mulf %114, %114 : vector<16x32xf32>
    %cst_56 = arith.constant dense<0.000000e+00> : vector<16xf32>
    %116 = vector.multi_reduction <add>, %115, %cst_56 [1] : vector<16x32xf32> to vector<16xf32>
    %117 = vector.shape_cast %116 : vector<16xf32> to vector<16x1xf32>
    %cst_57 = arith.constant 3.200000e+01 : f32
    %118 = vector.broadcast %cst_57 : f32 to vector<16x1xf32>
    %119 = arith.divf %117, %118 : vector<16x1xf32>
    %120 = vector.broadcast %112 : vector<16x1xf32> to vector<16x32xf32>
    %121 = arith.subf %108, %120 : vector<16x32xf32>
    %cst_58 = arith.constant 9.99999974E-6 : f32
    %122 = vector.broadcast %cst_58 : f32 to vector<16x1xf32>
    %123 = arith.addf %119, %122 : vector<16x1xf32>
    %124 = math.rsqrt %123 : vector<16x1xf32>
    %125 = vector.broadcast %124 : vector<16x1xf32> to vector<16x32xf32>
    %126 = arith.mulf %121, %125 : vector<16x32xf32>
    %127 = vector.broadcast %10 : vector<1x32xf32> to vector<16x32xf32>
    %128 = arith.mulf %126, %127 : vector<16x32xf32>
    %129 = vector.broadcast %12 : vector<1x32xf32> to vector<16x32xf32>
    %130 = arith.addf %128, %129 : vector<16x32xf32>
    %c0_59 = arith.constant 0 : index
    %c0_60 = arith.constant 0 : index
    %c0_61 = arith.constant 0 : index
    %131 = vector.load %arg3[%c0_59, %c0_60, %c0_61] : memref<2x32x64xf32, #tpu.memory_space<vmem>>, vector<1x32x64xf32>
    %132 = vector.shape_cast %131 : vector<1x32x64xf32> to vector<32x64xf32>
    %cst_62 = arith.constant dense<0.000000e+00> : vector<16x64xf32>
    %133 = tpu.matmul %130, %132, %cst_62 {dimension_numbers = #tpu.dot_dimension_numbers<[1], [0], [0], [1], [0, 0, 1, 1], [], []>} : vector<16x32xf32>, vector<32x64xf32>, vector<16x64xf32> -> vector<16x64xf32>
    %134 = vector.broadcast %6 : vector<1x64xf32> to vector<16x64xf32>
    %135 = arith.addf %133, %134 : vector<16x64xf32>
    %cst_63 = arith.constant 0.000000e+00 : f32
    %136 = vector.broadcast %cst_63 : f32 to vector<16x64xf32>
    %137 = arith.maximumf %135, %136 : vector<16x64xf32>
    %c0_64 = arith.constant 0 : index
    %c0_65 = arith.constant 0 : index
    %c0_66 = arith.constant 0 : index
    %138 = vector.load %arg4[%c0_64, %c0_65, %c0_66] : memref<2x64x32xf32, #tpu.memory_space<vmem>>, vector<1x64x32xf32>
    %139 = vector.shape_cast %138 : vector<1x64x32xf32> to vector<64x32xf32>
    %cst_67 = arith.constant dense<0.000000e+00> : vector<16x32xf32>
    %140 = tpu.matmul %137, %139, %cst_67 {dimension_numbers = #tpu.dot_dimension_numbers<[1], [0], [0], [1], [0, 0, 1, 1], [], []>} : vector<16x64xf32>, vector<64x32xf32>, vector<16x32xf32> -> vector<16x32xf32>
    %141 = vector.broadcast %8 : vector<1x32xf32> to vector<16x32xf32>
    %142 = arith.addf %140, %141 : vector<16x32xf32>
    %143 = arith.addf %130, %142 : vector<16x32xf32>
    %cst_68 = arith.constant dense<0.000000e+00> : vector<16xf32>
    %144 = vector.multi_reduction <add>, %143, %cst_68 [1] : vector<16x32xf32> to vector<16xf32>
    %145 = vector.shape_cast %144 : vector<16xf32> to vector<16x1xf32>
    %cst_69 = arith.constant 3.200000e+01 : f32
    %146 = vector.broadcast %cst_69 : f32 to vector<16x1xf32>
    %147 = arith.divf %145, %146 : vector<16x1xf32>
    %148 = vector.broadcast %147 : vector<16x1xf32> to vector<16x32xf32>
    %149 = arith.subf %143, %148 : vector<16x32xf32>
    %150 = arith.mulf %149, %149 : vector<16x32xf32>
    %cst_70 = arith.constant dense<0.000000e+00> : vector<16xf32>
    %151 = vector.multi_reduction <add>, %150, %cst_70 [1] : vector<16x32xf32> to vector<16xf32>
    %152 = vector.shape_cast %151 : vector<16xf32> to vector<16x1xf32>
    %cst_71 = arith.constant 3.200000e+01 : f32
    %153 = vector.broadcast %cst_71 : f32 to vector<16x1xf32>
    %154 = arith.divf %152, %153 : vector<16x1xf32>
    %155 = vector.broadcast %147 : vector<16x1xf32> to vector<16x32xf32>
    %156 = arith.subf %143, %155 : vector<16x32xf32>
    %cst_72 = arith.constant 9.99999974E-6 : f32
    %157 = vector.broadcast %cst_72 : f32 to vector<16x1xf32>
    %158 = arith.addf %154, %157 : vector<16x1xf32>
    %159 = math.rsqrt %158 : vector<16x1xf32>
    %160 = vector.broadcast %159 : vector<16x1xf32> to vector<16x32xf32>
    %161 = arith.mulf %156, %160 : vector<16x32xf32>
    %162 = vector.broadcast %14 : vector<1x32xf32> to vector<16x32xf32>
    %163 = arith.mulf %161, %162 : vector<16x32xf32>
    %164 = vector.broadcast %16 : vector<1x32xf32> to vector<16x32xf32>
    %165 = arith.addf %163, %164 : vector<16x32xf32>
    %c1_73 = arith.constant 1 : index
    %c0_74 = arith.constant 0 : index
    %c0_75 = arith.constant 0 : index
    %166 = vector.load %arg5[%c1_73, %c0_74, %c0_75] : memref<2x8x128xf32, #tpu.memory_space<vmem>>, vector<1x1x96xf32>
    %167 = vector.shape_cast %166 : vector<1x1x96xf32> to vector<1x96xf32>
    %c1_76 = arith.constant 1 : index
    %c1_77 = arith.constant 1 : index
    %c0_78 = arith.constant 0 : index
    %168 = vector.load %arg5[%c1_76, %c1_77, %c0_78] : memref<2x8x128xf32, #tpu.memory_space<vmem>>, vector<1x1x32xf32>
    %169 = vector.shape_cast %168 : vector<1x1x32xf32> to vector<1x32xf32>
    %c1_79 = arith.constant 1 : index
    %c2_80 = arith.constant 2 : index
    %c0_81 = arith.constant 0 : index
    %170 = vector.load %arg5[%c1_79, %c2_80, %c0_81] : memref<2x8x128xf32, #tpu.memory_space<vmem>>, vector<1x1x64xf32>
    %171 = vector.shape_cast %170 : vector<1x1x64xf32> to vector<1x64xf32>
    %c1_82 = arith.constant 1 : index
    %c3_83 = arith.constant 3 : index
    %c0_84 = arith.constant 0 : index
    %172 = vector.load %arg5[%c1_82, %c3_83, %c0_84] : memref<2x8x128xf32, #tpu.memory_space<vmem>>, vector<1x1x32xf32>
    %173 = vector.shape_cast %172 : vector<1x1x32xf32> to vector<1x32xf32>
    %c1_85 = arith.constant 1 : index
    %c4_86 = arith.constant 4 : index
    %c0_87 = arith.constant 0 : index
    %174 = vector.load %arg5[%c1_85, %c4_86, %c0_87] : memref<2x8x128xf32, #tpu.memory_space<vmem>>, vector<1x1x32xf32>
    %175 = vector.shape_cast %174 : vector<1x1x32xf32> to vector<1x32xf32>
    %c1_88 = arith.constant 1 : index
    %c5_89 = arith.constant 5 : index
    %c0_90 = arith.constant 0 : index
    %176 = vector.load %arg5[%c1_88, %c5_89, %c0_90] : memref<2x8x128xf32, #tpu.memory_space<vmem>>, vector<1x1x32xf32>
    %177 = vector.shape_cast %176 : vector<1x1x32xf32> to vector<1x32xf32>
    %c1_91 = arith.constant 1 : index
    %c6_92 = arith.constant 6 : index
    %c0_93 = arith.constant 0 : index
    %178 = vector.load %arg5[%c1_91, %c6_92, %c0_93] : memref<2x8x128xf32, #tpu.memory_space<vmem>>, vector<1x1x32xf32>
    %179 = vector.shape_cast %178 : vector<1x1x32xf32> to vector<1x32xf32>
    %c1_94 = arith.constant 1 : index
    %c7_95 = arith.constant 7 : index
    %c0_96 = arith.constant 0 : index
    %180 = vector.load %arg5[%c1_94, %c7_95, %c0_96] : memref<2x8x128xf32, #tpu.memory_space<vmem>>, vector<1x1x32xf32>
    %181 = vector.shape_cast %180 : vector<1x1x32xf32> to vector<1x32xf32>
    %c1_97 = arith.constant 1 : index
    %c0_98 = arith.constant 0 : index
    %c0_99 = arith.constant 0 : index
    %182 = vector.load %arg1[%c1_97, %c0_98, %c0_99] : memref<2x32x96xf32, #tpu.memory_space<vmem>>, vector<1x32x96xf32>
    %183 = vector.shape_cast %182 : vector<1x32x96xf32> to vector<32x96xf32>
    %cst_100 = arith.constant dense<0.000000e+00> : vector<16x96xf32>
    %184 = tpu.matmul %165, %183, %cst_100 {dimension_numbers = #tpu.dot_dimension_numbers<[1], [0], [0], [1], [0, 0, 1, 1], [], []>} : vector<16x32xf32>, vector<32x96xf32>, vector<16x96xf32> -> vector<16x96xf32>
    %185 = vector.broadcast %167 : vector<1x96xf32> to vector<16x96xf32>
    %186 = arith.addf %184, %185 : vector<16x96xf32>
    %187 = vector.shape_cast %186 : vector<16x96xf32> to vector<2x8x96xf32>
    %188 = vector.extract_strided_slice %187 {offsets = [0, 0, 0], sizes = [2, 8, 8], strides = [1, 1, 1]} : vector<2x8x96xf32> to vector<2x8x8xf32>
    %189 = vector.extract_strided_slice %187 {offsets = [0, 0, 32], sizes = [2, 8, 8], strides = [1, 1, 1]} : vector<2x8x96xf32> to vector<2x8x8xf32>
    %190 = vector.extract_strided_slice %187 {offsets = [0, 0, 64], sizes = [2, 8, 8], strides = [1, 1, 1]} : vector<2x8x96xf32> to vector<2x8x8xf32>
    "tpu.trace_start"() <{level = 10 : i32, message = "nqd,nkd->nqk"}> : () -> ()
    %cst_101 = arith.constant dense<0.000000e+00> : vector<2x8x8xf32>
    %191 = tpu.matmul %188, %189, %cst_101 {dimension_numbers = #tpu.dot_dimension_numbers<[2], [2], [1], [1], [0, 0, 0, 1, 1, 1], [0], [0]>} : vector<2x8x8xf32>, vector<2x8x8xf32>, vector<2x8x8xf32> -> vector<2x8x8xf32>
    "tpu.trace_stop"() : () -> ()
    %cst_102 = arith.constant 0.353553385 : f32
    %192 = vector.broadcast %cst_102 : f32 to vector<2x8x8xf32>
    %193 = arith.mulf %191, %192 : vector<2x8x8xf32>
    %cst_103 = arith.constant dense<0xFF800000> : vector<2x8xf32>
    %194 = vector.multi_reduction <maximumf>, %193, %cst_103 [2] : vector<2x8x8xf32> to vector<2x8xf32>
    %195 = vector.shape_cast %194 : vector<2x8xf32> to vector<2x8x1xf32>
    %196 = vector.broadcast %195 : vector<2x8x1xf32> to vector<2x8x8xf32>
    %197 = arith.subf %193, %196 : vector<2x8x8xf32>
    %198 = math.exp %197 : vector<2x8x8xf32>
    %cst_104 = arith.constant dense<0.000000e+00> : vector<2x8xf32>
    %199 = vector.multi_reduction <add>, %198, %cst_104 [2] : vector<2x8x8xf32> to vector<2x8xf32>
    %200 = vector.shape_cast %199 : vector<2x8xf32> to vector<2x8x1xf32>
    %201 = vector.broadcast %200 : vector<2x8x1xf32> to vector<2x8x8xf32>
    %202 = arith.divf %198, %201 : vector<2x8x8xf32>
    "tpu.trace_start"() <{level = 10 : i32, message = "nqk,nkd->nqd"}> : () -> ()
    %cst_105 = arith.constant dense<0.000000e+00> : vector<2x8x8xf32>
    %203 = tpu.matmul %202, %190, %cst_105 {dimension_numbers = #tpu.dot_dimension_numbers<[2], [1], [1], [2], [0, 0, 0, 1, 1, 2], [0], [0]>} : vector<2x8x8xf32>, vector<2x8x8xf32>, vector<2x8x8xf32> -> vector<2x8x8xf32>
    "tpu.trace_stop"() : () -> ()
    %204 = vector.shape_cast %203 : vector<2x8x8xf32> to vector<16x8xf32>
    %c1_106 = arith.constant 1 : index
    %c0_107 = arith.constant 0 : index
    %c0_108 = arith.constant 0 : index
    %205 = vector.load %arg2[%c1_106, %c0_107, %c0_108] : memref<2x32x32xf32, #tpu.memory_space<vmem>>, vector<1x8x32xf32>
    %206 = vector.shape_cast %205 : vector<1x8x32xf32> to vector<8x32xf32>
    %cst_109 = arith.constant dense<0.000000e+00> : vector<16x32xf32>
    %207 = tpu.matmul %204, %206, %cst_109 {dimension_numbers = #tpu.dot_dimension_numbers<[1], [0], [0], [1], [0, 0, 1, 1], [], []>} : vector<16x8xf32>, vector<8x32xf32>, vector<16x32xf32> -> vector<16x32xf32>
    %208 = vector.extract_strided_slice %187 {offsets = [0, 0, 8], sizes = [2, 8, 8], strides = [1, 1, 1]} : vector<2x8x96xf32> to vector<2x8x8xf32>
    %209 = vector.extract_strided_slice %187 {offsets = [0, 0, 40], sizes = [2, 8, 8], strides = [1, 1, 1]} : vector<2x8x96xf32> to vector<2x8x8xf32>
    %210 = vector.extract_strided_slice %187 {offsets = [0, 0, 72], sizes = [2, 8, 8], strides = [1, 1, 1]} : vector<2x8x96xf32> to vector<2x8x8xf32>
    "tpu.trace_start"() <{level = 10 : i32, message = "nqd,nkd->nqk"}> : () -> ()
    %cst_110 = arith.constant dense<0.000000e+00> : vector<2x8x8xf32>
    %211 = tpu.matmul %208, %209, %cst_110 {dimension_numbers = #tpu.dot_dimension_numbers<[2], [2], [1], [1], [0, 0, 0, 1, 1, 1], [0], [0]>} : vector<2x8x8xf32>, vector<2x8x8xf32>, vector<2x8x8xf32> -> vector<2x8x8xf32>
    "tpu.trace_stop"() : () -> ()
    %cst_111 = arith.constant 0.353553385 : f32
    %212 = vector.broadcast %cst_111 : f32 to vector<2x8x8xf32>
    %213 = arith.mulf %211, %212 : vector<2x8x8xf32>
    %cst_112 = arith.constant dense<0xFF800000> : vector<2x8xf32>
    %214 = vector.multi_reduction <maximumf>, %213, %cst_112 [2] : vector<2x8x8xf32> to vector<2x8xf32>
    %215 = vector.shape_cast %214 : vector<2x8xf32> to vector<2x8x1xf32>
    %216 = vector.broadcast %215 : vector<2x8x1xf32> to vector<2x8x8xf32>
    %217 = arith.subf %213, %216 : vector<2x8x8xf32>
    %218 = math.exp %217 : vector<2x8x8xf32>
    %cst_113 = arith.constant dense<0.000000e+00> : vector<2x8xf32>
    %219 = vector.multi_reduction <add>, %218, %cst_113 [2] : vector<2x8x8xf32> to vector<2x8xf32>
    %220 = vector.shape_cast %219 : vector<2x8xf32> to vector<2x8x1xf32>
    %221 = vector.broadcast %220 : vector<2x8x1xf32> to vector<2x8x8xf32>
    %222 = arith.divf %218, %221 : vector<2x8x8xf32>
    "tpu.trace_start"() <{level = 10 : i32, message = "nqk,nkd->nqd"}> : () -> ()
    %cst_114 = arith.constant dense<0.000000e+00> : vector<2x8x8xf32>
    %223 = tpu.matmul %222, %210, %cst_114 {dimension_numbers = #tpu.dot_dimension_numbers<[2], [1], [1], [2], [0, 0, 0, 1, 1, 2], [0], [0]>} : vector<2x8x8xf32>, vector<2x8x8xf32>, vector<2x8x8xf32> -> vector<2x8x8xf32>
    "tpu.trace_stop"() : () -> ()
    %224 = vector.shape_cast %223 : vector<2x8x8xf32> to vector<16x8xf32>
    %c1_115 = arith.constant 1 : index
    %c8_116 = arith.constant 8 : index
    %c0_117 = arith.constant 0 : index
    %225 = vector.load %arg2[%c1_115, %c8_116, %c0_117] : memref<2x32x32xf32, #tpu.memory_space<vmem>>, vector<1x8x32xf32>
    %226 = vector.shape_cast %225 : vector<1x8x32xf32> to vector<8x32xf32>
    %cst_118 = arith.constant dense<0.000000e+00> : vector<16x32xf32>
    %227 = tpu.matmul %224, %226, %cst_118 {dimension_numbers = #tpu.dot_dimension_numbers<[1], [0], [0], [1], [0, 0, 1, 1], [], []>} : vector<16x8xf32>, vector<8x32xf32>, vector<16x32xf32> -> vector<16x32xf32>
    %228 = arith.addf %207, %227 : vector<16x32xf32>
    %229 = vector.extract_strided_slice %187 {offsets = [0, 0, 16], sizes = [2, 8, 8], strides = [1, 1, 1]} : vector<2x8x96xf32> to vector<2x8x8xf32>
    %230 = vector.extract_strided_slice %187 {offsets = [0, 0, 48], sizes = [2, 8, 8], strides = [1, 1, 1]} : vector<2x8x96xf32> to vector<2x8x8xf32>
    %231 = vector.extract_strided_slice %187 {offsets = [0, 0, 80], sizes = [2, 8, 8], strides = [1, 1, 1]} : vector<2x8x96xf32> to vector<2x8x8xf32>
    "tpu.trace_start"() <{level = 10 : i32, message = "nqd,nkd->nqk"}> : () -> ()
    %cst_119 = arith.constant dense<0.000000e+00> : vector<2x8x8xf32>
    %232 = tpu.matmul %229, %230, %cst_119 {dimension_numbers = #tpu.dot_dimension_numbers<[2], [2], [1], [1], [0, 0, 0, 1, 1, 1], [0], [0]>} : vector<2x8x8xf32>, vector<2x8x8xf32>, vector<2x8x8xf32> -> vector<2x8x8xf32>
    "tpu.trace_stop"() : () -> ()
    %cst_120 = arith.constant 0.353553385 : f32
    %233 = vector.broadcast %cst_120 : f32 to vector<2x8x8xf32>
    %234 = arith.mulf %232, %233 : vector<2x8x8xf32>
    %cst_121 = arith.constant dense<0xFF800000> : vector<2x8xf32>
    %235 = vector.multi_reduction <maximumf>, %234, %cst_121 [2] : vector<2x8x8xf32> to vector<2x8xf32>
    %236 = vector.shape_cast %235 : vector<2x8xf32> to vector<2x8x1xf32>
    %237 = vector.broadcast %236 : vector<2x8x1xf32> to vector<2x8x8xf32>
    %238 = arith.subf %234, %237 : vector<2x8x8xf32>
    %239 = math.exp %238 : vector<2x8x8xf32>
    %cst_122 = arith.constant dense<0.000000e+00> : vector<2x8xf32>
    %240 = vector.multi_reduction <add>, %239, %cst_122 [2] : vector<2x8x8xf32> to vector<2x8xf32>
    %241 = vector.shape_cast %240 : vector<2x8xf32> to vector<2x8x1xf32>
    %242 = vector.broadcast %241 : vector<2x8x1xf32> to vector<2x8x8xf32>
    %243 = arith.divf %239, %242 : vector<2x8x8xf32>
    "tpu.trace_start"() <{level = 10 : i32, message = "nqk,nkd->nqd"}> : () -> ()
    %cst_123 = arith.constant dense<0.000000e+00> : vector<2x8x8xf32>
    %244 = tpu.matmul %243, %231, %cst_123 {dimension_numbers = #tpu.dot_dimension_numbers<[2], [1], [1], [2], [0, 0, 0, 1, 1, 2], [0], [0]>} : vector<2x8x8xf32>, vector<2x8x8xf32>, vector<2x8x8xf32> -> vector<2x8x8xf32>
    "tpu.trace_stop"() : () -> ()
    %245 = vector.shape_cast %244 : vector<2x8x8xf32> to vector<16x8xf32>
    %c1_124 = arith.constant 1 : index
    %c16_125 = arith.constant 16 : index
    %c0_126 = arith.constant 0 : index
    %246 = vector.load %arg2[%c1_124, %c16_125, %c0_126] : memref<2x32x32xf32, #tpu.memory_space<vmem>>, vector<1x8x32xf32>
    %247 = vector.shape_cast %246 : vector<1x8x32xf32> to vector<8x32xf32>
    %cst_127 = arith.constant dense<0.000000e+00> : vector<16x32xf32>
    %248 = tpu.matmul %245, %247, %cst_127 {dimension_numbers = #tpu.dot_dimension_numbers<[1], [0], [0], [1], [0, 0, 1, 1], [], []>} : vector<16x8xf32>, vector<8x32xf32>, vector<16x32xf32> -> vector<16x32xf32>
    %249 = arith.addf %228, %248 : vector<16x32xf32>
    %250 = vector.extract_strided_slice %187 {offsets = [0, 0, 24], sizes = [2, 8, 8], strides = [1, 1, 1]} : vector<2x8x96xf32> to vector<2x8x8xf32>
    %251 = vector.extract_strided_slice %187 {offsets = [0, 0, 56], sizes = [2, 8, 8], strides = [1, 1, 1]} : vector<2x8x96xf32> to vector<2x8x8xf32>
    %252 = vector.extract_strided_slice %187 {offsets = [0, 0, 88], sizes = [2, 8, 8], strides = [1, 1, 1]} : vector<2x8x96xf32> to vector<2x8x8xf32>
    "tpu.trace_start"() <{level = 10 : i32, message = "nqd,nkd->nqk"}> : () -> ()
    %cst_128 = arith.constant dense<0.000000e+00> : vector<2x8x8xf32>
    %253 = tpu.matmul %250, %251, %cst_128 {dimension_numbers = #tpu.dot_dimension_numbers<[2], [2], [1], [1], [0, 0, 0, 1, 1, 1], [0], [0]>} : vector<2x8x8xf32>, vector<2x8x8xf32>, vector<2x8x8xf32> -> vector<2x8x8xf32>
    "tpu.trace_stop"() : () -> ()
    %cst_129 = arith.constant 0.353553385 : f32
    %254 = vector.broadcast %cst_129 : f32 to vector<2x8x8xf32>
    %255 = arith.mulf %253, %254 : vector<2x8x8xf32>
    %cst_130 = arith.constant dense<0xFF800000> : vector<2x8xf32>
    %256 = vector.multi_reduction <maximumf>, %255, %cst_130 [2] : vector<2x8x8xf32> to vector<2x8xf32>
    %257 = vector.shape_cast %256 : vector<2x8xf32> to vector<2x8x1xf32>
    %258 = vector.broadcast %257 : vector<2x8x1xf32> to vector<2x8x8xf32>
    %259 = arith.subf %255, %258 : vector<2x8x8xf32>
    %260 = math.exp %259 : vector<2x8x8xf32>
    %cst_131 = arith.constant dense<0.000000e+00> : vector<2x8xf32>
    %261 = vector.multi_reduction <add>, %260, %cst_131 [2] : vector<2x8x8xf32> to vector<2x8xf32>
    %262 = vector.shape_cast %261 : vector<2x8xf32> to vector<2x8x1xf32>
    %263 = vector.broadcast %262 : vector<2x8x1xf32> to vector<2x8x8xf32>
    %264 = arith.divf %260, %263 : vector<2x8x8xf32>
    "tpu.trace_start"() <{level = 10 : i32, message = "nqk,nkd->nqd"}> : () -> ()
    %cst_132 = arith.constant dense<0.000000e+00> : vector<2x8x8xf32>
    %265 = tpu.matmul %264, %252, %cst_132 {dimension_numbers = #tpu.dot_dimension_numbers<[2], [1], [1], [2], [0, 0, 0, 1, 1, 2], [0], [0]>} : vector<2x8x8xf32>, vector<2x8x8xf32>, vector<2x8x8xf32> -> vector<2x8x8xf32>
    "tpu.trace_stop"() : () -> ()
    %266 = vector.shape_cast %265 : vector<2x8x8xf32> to vector<16x8xf32>
    %c1_133 = arith.constant 1 : index
    %c24_134 = arith.constant 24 : index
    %c0_135 = arith.constant 0 : index
    %267 = vector.load %arg2[%c1_133, %c24_134, %c0_135] : memref<2x32x32xf32, #tpu.memory_space<vmem>>, vector<1x8x32xf32>
    %268 = vector.shape_cast %267 : vector<1x8x32xf32> to vector<8x32xf32>
    %cst_136 = arith.constant dense<0.000000e+00> : vector<16x32xf32>
    %269 = tpu.matmul %266, %268, %cst_136 {dimension_numbers = #tpu.dot_dimension_numbers<[1], [0], [0], [1], [0, 0, 1, 1], [], []>} : vector<16x8xf32>, vector<8x32xf32>, vector<16x32xf32> -> vector<16x32xf32>
    %270 = arith.addf %249, %269 : vector<16x32xf32>
    %271 = vector.broadcast %169 : vector<1x32xf32> to vector<16x32xf32>
    %272 = arith.addf %270, %271 : vector<16x32xf32>
    %273 = arith.addf %165, %272 : vector<16x32xf32>
    %cst_137 = arith.constant dense<0.000000e+00> : vector<16xf32>
    %274 = vector.multi_reduction <add>, %273, %cst_137 [1] : vector<16x32xf32> to vector<16xf32>
    %275 = vector.shape_cast %274 : vector<16xf32> to vector<16x1xf32>
    %cst_138 = arith.constant 3.200000e+01 : f32
    %276 = vector.broadcast %cst_138 : f32 to vector<16x1xf32>
    %277 = arith.divf %275, %276 : vector<16x1xf32>
    %278 = vector.broadcast %277 : vector<16x1xf32> to vector<16x32xf32>
    %279 = arith.subf %273, %278 : vector<16x32xf32>
    %280 = arith.mulf %279, %279 : vector<16x32xf32>
    %cst_139 = arith.constant dense<0.000000e+00> : vector<16xf32>
    %281 = vector.multi_reduction <add>, %280, %cst_139 [1] : vector<16x32xf32> to vector<16xf32>
    %282 = vector.shape_cast %281 : vector<16xf32> to vector<16x1xf32>
    %cst_140 = arith.constant 3.200000e+01 : f32
    %283 = vector.broadcast %cst_140 : f32 to vector<16x1xf32>
    %284 = arith.divf %282, %283 : vector<16x1xf32>
    %285 = vector.broadcast %277 : vector<16x1xf32> to vector<16x32xf32>
    %286 = arith.subf %273, %285 : vector<16x32xf32>
    %cst_141 = arith.constant 9.99999974E-6 : f32
    %287 = vector.broadcast %cst_141 : f32 to vector<16x1xf32>
    %288 = arith.addf %284, %287 : vector<16x1xf32>
    %289 = math.rsqrt %288 : vector<16x1xf32>
    %290 = vector.broadcast %289 : vector<16x1xf32> to vector<16x32xf32>
    %291 = arith.mulf %286, %290 : vector<16x32xf32>
    %292 = vector.broadcast %175 : vector<1x32xf32> to vector<16x32xf32>
    %293 = arith.mulf %291, %292 : vector<16x32xf32>
    %294 = vector.broadcast %177 : vector<1x32xf32> to vector<16x32xf32>
    %295 = arith.addf %293, %294 : vector<16x32xf32>
    %c1_142 = arith.constant 1 : index
    %c0_143 = arith.constant 0 : index
    %c0_144 = arith.constant 0 : index
    %296 = vector.load %arg3[%c1_142, %c0_143, %c0_144] : memref<2x32x64xf32, #tpu.memory_space<vmem>>, vector<1x32x64xf32>
    %297 = vector.shape_cast %296 : vector<1x32x64xf32> to vector<32x64xf32>
    %cst_145 = arith.constant dense<0.000000e+00> : vector<16x64xf32>
    %298 = tpu.matmul %295, %297, %cst_145 {dimension_numbers = #tpu.dot_dimension_numbers<[1], [0], [0], [1], [0, 0, 1, 1], [], []>} : vector<16x32xf32>, vector<32x64xf32>, vector<16x64xf32> -> vector<16x64xf32>
    %299 = vector.broadcast %171 : vector<1x64xf32> to vector<16x64xf32>
    %300 = arith.addf %298, %299 : vector<16x64xf32>
    %cst_146 = arith.constant 0.000000e+00 : f32
    %301 = vector.broadcast %cst_146 : f32 to vector<16x64xf32>
    %302 = arith.maximumf %300, %301 : vector<16x64xf32>
    %c1_147 = arith.constant 1 : index
    %c0_148 = arith.constant 0 : index
    %c0_149 = arith.constant 0 : index
    %303 = vector.load %arg4[%c1_147, %c0_148, %c0_149] : memref<2x64x32xf32, #tpu.memory_space<vmem>>, vector<1x64x32xf32>
    %304 = vector.shape_cast %303 : vector<1x64x32xf32> to vector<64x32xf32>
    %cst_150 = arith.constant dense<0.000000e+00> : vector<16x32xf32>
    %305 = tpu.matmul %302, %304, %cst_150 {dimension_numbers = #tpu.dot_dimension_numbers<[1], [0], [0], [1], [0, 0, 1, 1], [], []>} : vector<16x64xf32>, vector<64x32xf32>, vector<16x32xf32> -> vector<16x32xf32>
    %306 = vector.broadcast %173 : vector<1x32xf32> to vector<16x32xf32>
    %307 = arith.addf %305, %306 : vector<16x32xf32>
    %308 = arith.addf %295, %307 : vector<16x32xf32>
    %cst_151 = arith.constant dense<0.000000e+00> : vector<16xf32>
    %309 = vector.multi_reduction <add>, %308, %cst_151 [1] : vector<16x32xf32> to vector<16xf32>
    %310 = vector.shape_cast %309 : vector<16xf32> to vector<16x1xf32>
    %cst_152 = arith.constant 3.200000e+01 : f32
    %311 = vector.broadcast %cst_152 : f32 to vector<16x1xf32>
    %312 = arith.divf %310, %311 : vector<16x1xf32>
    %313 = vector.broadcast %312 : vector<16x1xf32> to vector<16x32xf32>
    %314 = arith.subf %308, %313 : vector<16x32xf32>
    %315 = arith.mulf %314, %314 : vector<16x32xf32>
    %cst_153 = arith.constant dense<0.000000e+00> : vector<16xf32>
    %316 = vector.multi_reduction <add>, %315, %cst_153 [1] : vector<16x32xf32> to vector<16xf32>
    %317 = vector.shape_cast %316 : vector<16xf32> to vector<16x1xf32>
    %cst_154 = arith.constant 3.200000e+01 : f32
    %318 = vector.broadcast %cst_154 : f32 to vector<16x1xf32>
    %319 = arith.divf %317, %318 : vector<16x1xf32>
    %320 = vector.broadcast %312 : vector<16x1xf32> to vector<16x32xf32>
    %321 = arith.subf %308, %320 : vector<16x32xf32>
    %cst_155 = arith.constant 9.99999974E-6 : f32
    %322 = vector.broadcast %cst_155 : f32 to vector<16x1xf32>
    %323 = arith.addf %319, %322 : vector<16x1xf32>
    %324 = math.rsqrt %323 : vector<16x1xf32>
    %325 = vector.broadcast %324 : vector<16x1xf32> to vector<16x32xf32>
    %326 = arith.mulf %321, %325 : vector<16x32xf32>
    %327 = vector.broadcast %179 : vector<1x32xf32> to vector<16x32xf32>
    %328 = arith.mulf %326, %327 : vector<16x32xf32>
    %329 = vector.broadcast %181 : vector<1x32xf32> to vector<16x32xf32>
    %330 = arith.addf %328, %329 : vector<16x32xf32>
    %331 = vector.extract_strided_slice %330 {offsets = [0, 0], sizes = [8, 32], strides = [1, 1]} : vector<16x32xf32> to vector<8x32xf32>
    %332 = vector.extract_strided_slice %330 {offsets = [8, 0], sizes = [8, 32], strides = [1, 1]} : vector<16x32xf32> to vector<8x32xf32>
    %333 = arith.addf %331, %332 : vector<8x32xf32>
    %cst_156 = arith.constant 5.000000e-01 : f32
    %334 = vector.broadcast %cst_156 : f32 to vector<8x32xf32>
    %335 = arith.mulf %333, %334 : vector<8x32xf32>
    %c0_157 = arith.constant 0 : index
    %c0_158 = arith.constant 0 : index
    %c0_159 = arith.constant 0 : index
    %336 = vector.load %arg6[%c0_157, %c0_158, %c0_159] : memref<2x136x128xf32, #tpu.memory_space<vmem>>, vector<1x32x128xf32>
    %337 = vector.shape_cast %336 : vector<1x32x128xf32> to vector<32x128xf32>
    %c0_160 = arith.constant 0 : index
    %c128 = arith.constant 128 : index
    %c0_161 = arith.constant 0 : index
    %338 = vector.load %arg6[%c0_160, %c128, %c0_161] : memref<2x136x128xf32, #tpu.memory_space<vmem>>, vector<1x1x128xf32>
    %339 = vector.shape_cast %338 : vector<1x1x128xf32> to vector<1x128xf32>
    %cst_162 = arith.constant dense<0.000000e+00> : vector<8x128xf32>
    %340 = tpu.matmul %335, %337, %cst_162 {dimension_numbers = #tpu.dot_dimension_numbers<[1], [0], [0], [1], [0, 0, 1, 1], [], []>} : vector<8x32xf32>, vector<32x128xf32>, vector<8x128xf32> -> vector<8x128xf32>
    %341 = vector.broadcast %339 : vector<1x128xf32> to vector<8x128xf32>
    %342 = arith.addf %340, %341 : vector<8x128xf32>
    %c1_163 = arith.constant 1 : index
    %c0_164 = arith.constant 0 : index
    %c0_165 = arith.constant 0 : index
    %343 = vector.load %arg6[%c1_163, %c0_164, %c0_165] : memref<2x136x128xf32, #tpu.memory_space<vmem>>, vector<1x128x128xf32>
    %344 = vector.shape_cast %343 : vector<1x128x128xf32> to vector<128x128xf32>
    %c1_166 = arith.constant 1 : index
    %c128_167 = arith.constant 128 : index
    %c0_168 = arith.constant 0 : index
    %345 = vector.load %arg6[%c1_166, %c128_167, %c0_168] : memref<2x136x128xf32, #tpu.memory_space<vmem>>, vector<1x1x128xf32>
    %346 = vector.shape_cast %345 : vector<1x1x128xf32> to vector<1x128xf32>
    %cst_169 = arith.constant dense<0.000000e+00> : vector<8x128xf32>
    %347 = tpu.matmul %342, %344, %cst_169 {dimension_numbers = #tpu.dot_dimension_numbers<[1], [0], [0], [1], [0, 0, 1, 1], [], []>} : vector<8x128xf32>, vector<128x128xf32>, vector<8x128xf32> -> vector<8x128xf32>
    %348 = vector.broadcast %346 : vector<1x128xf32> to vector<8x128xf32>
    %349 = arith.addf %347, %348 : vector<8x128xf32>
    %c0_170 = arith.constant 0 : index
    %c0_171 = arith.constant 0 : index
    %350 = vector.load %arg7[%c0_170, %c0_171] : memref<8x128xf32, #tpu.memory_space<vmem>>, vector<8x128xf32>
    tpu.vector_store %arg7[%c0_170, %c0_171], %349 {strides = array<i32>} : memref<8x128xf32, #tpu.memory_space<vmem>>, vector<8x128xf32>,
    return
  }
}

</mosaic_0001>

<bundles_post_ra>
// kernel: tpu_custom_call.1
= control target key start
LH: loop header
LB: loop body
LE: loop exit
PB: predicated region body
PF: predicated region fallthrough
CT: control target
= control target key end

     0   :  { %12 = vsyncpa [#allocation3], 0  ;;  %s5680_s0 = inlined_call_operand.hbm [shape: f32[16,32], index: 0, kind: input, shape index: {}]   ;;  %s5681_s1 = inlined_call_operand.vmem [shape: f32[2,32,96], index: 1, kind: input, shape index: {}]   ;;  %s5682_s2 = inlined_call_operand.vmem [shape: f32[2,32,32], index: 2, kind: input, shape index: {}]   ;;  %s5683_s3 = inlined_call_operand.vmem [shape: f32[2,32,64], index: 3, kind: input, shape index: {}]   ;;  %s5684_s4 = inlined_call_operand.vmem [shape: f32[2,64,32], index: 4, kind: input, shape index: {}]   ;;  %s5685_s5 = inlined_call_operand.hbm [shape: f32[2,8,128], index: 5, kind: input, shape index: {}]   ;;  %s5686_s6 = inlined_call_operand.hbm [shape: f32[2,136,128], index: 6, kind: input, shape index: {}]   ;;  %s5687_s7 = inlined_call_operand.hbm [shape: f32[8,128], index: 7, kind: output, shape index: {}]  }
   0x1   :  { %13 = vsyncpa [#allocation6], 0 }
   0x2   :  { %14 = vsyncpa [#allocation4], 0  ;;  %s5104_s24 = smov [#allocation5]   ;;  %s5105_s26 = smov [#allocation2]  }
   0x3   :  { %s40_s25 = sshll.u32 %s5104_s24, 4  ;;  %s20_s27 = sshll.u32 %s5105_s26, 4  ;;  %s41_s25 = int_to_ptr.vmem [resolvable:$true] %s40_s25  ;;  %s21_s27 = int_to_ptr.vmem [resolvable:$true] %s20_s27 }
   0x4   :  { %s5026_s28 = scalar_lea.vmem %s41_s25, 256  ;;  %p5031_p1 = scmp.lt.s32.totalorder %s41_s25, %s41_s25 }
   0x5   :  { %p5027_p0 = scmp.ne.s32.totalorder %s41_s25, %s5026_s28  ;;  %p5032_p2 = scmp.lt.s32.totalorder %s5026_s28, %s5026_s28 }
   0x7   :  { %p5033_p3 = por %p5032_p2, %p5031_p1 }
   0x9   :  { %p5034_p4 = pnand %p5033_p3, %p5027_p0 }
   0xb   :  { %5037 = shalt.err (!%p5034_p4)
}
   0xc   :  { %s5106_s29 = smov 128   ;;  %s5107_s30 = smov 8  }
   0xd   :  { %46 = dma.hbm_to_vmem [thread:$0]  %s5685_s5, 256, %s41_s25, [#allocation6], %s5106_s29, %s5106_s29, %s5107_s30  }
   0xe   :  { %s5046_s10 = scalar_lea.vmem %s21_s27, 256  ;;  %p5051_p6 = scmp.lt.s32.totalorder %s21_s27, %s21_s27 }
   0xf   :  { %p5047_p5 = scmp.ne.s32.totalorder %s21_s27, %s5046_s10  ;;  %p5052_p7 = scmp.lt.s32.totalorder %s5046_s10, %s5046_s10 }
  0x11   :  { %p5053_p8 = por %p5052_p7, %p5051_p6 }
  0x13   :  { %p5054_p9 = pnand %p5053_p8, %p5047_p5 }
  0x15   :  { %5057 = shalt.err (!%p5054_p9)
}
  0x16   :  { %26 = dma.hbm_to_vmem [thread:$0]  %s5680_s0, 256, %s21_s27, [#allocation3], %s5106_s29, %s5106_s29, %s5107_s30  }
  0x17   :  { %s5108_s13 = smov [#allocation7]  }
  0x18   :  { %s52_s14 = sshll.u32 %s5108_s13, 4  ;;  %s53_s14 = int_to_ptr.vmem [resolvable:$true] %s52_s14 }
  0x19   :  { %s5066_s15 = scalar_lea.vmem %s53_s14, 4352  ;;  %p5071_p11 = scmp.lt.s32.totalorder %s53_s14, %s53_s14 }
  0x1a   :  { %p5067_p10 = scmp.ne.s32.totalorder %s53_s14, %s5066_s15  ;;  %p5072_p12 = scmp.lt.s32.totalorder %s5066_s15, %s5066_s15 }
  0x1c   :  { %p5073_p13 = por %p5072_p12, %p5071_p11 }
  0x1e   :  { %p5074_p0 = pnand %p5073_p13, %p5067_p10 }
  0x20   :  { %5077 = shalt.err (!%p5074_p0)
}
  0x21   :  { %58 = dma.hbm_to_vmem [thread:$0]  %s5686_s6, 4352, %s53_s14, [#allocation6], %s5106_s29, %s5106_s29, %s5107_s30  }
  0x22   :  { %5098 = dma.done.wait [#allocation3], 256  }
  0x23   :  { %5099 = vsyncadd [#allocation3], 4294967040 }
  0x24   :  { %5100 = dma.done.wait [#allocation6], 4608  }
  0x25   :  { %5101 = vsyncadd [#allocation6], 4294962688  ;;  %vm86_vm0 = vcmask 261120   ;;  %v81_v0 = vld [vmem:[%s5681_s1 + $0x18] sm:$0xff]  ;;  %v80_v1 = vld [vmem:[%s5681_s1 + $0x10] sm:$0xff]  ;;  %v5109_v6 = vmov 0.0  }
  0x26   :  { %4591 = vmatprep.subr.mxu1 %v81_v0  ;;  %v5178_v2 = vld [vmem:[#allocation2] sm:$0xff]  ;;  %v79_v3 = vld [vmem:[%s5681_s1 + $0x8] sm:$0xff]  ;;  %4612 = vmatprep.subr.mxu0 %v5109_v6  ;;  %vm5110_vm1 = vmmov 0   ;;  %v4322_v8 = vld [vmem:[#allocation5] ss:$0 sm:$0xff]  ;;  %s5111_s23 = smov 96  }
  0x27   :  { %4592 = vmatpush3.msra.mxu1 %v81_v0  ;;  %4599 = vmatprep.mubr.msk.f32.mxu1 %vm86_vm0, %v5178_v2  ;;  %v78_v4 = vld [vmem:[%s5681_s1] sm:$0xff]  ;;  %v5188_v5 = vld [vmem:[#allocation2 + $0x8] sm:$0xff]  ;;  %vm171_vm2 = vcmask 64512   ;;  %s5112_s24 = smov 64   ;;  %s5113_s25 = smov 88   ;;  %vm1977_vm3 = vcmask 523264  }
  0x28   :  { %4593 = vmatprep.subr.mxu1 %v80_v1  ;;  %4614 = vmatprep.mubr.msk.f32.mxu0 %vm5110_vm1, %v5109_v6  ;;  %s5114_s26 = smov 120   ;;  %s5115_s27 = smov 56  }
  0x29   :  { %4594 = vmatpush3.msra.mxu1 %v80_v1  ;;  %s5116_s28 = smov 112   ;;  %s5117_s29 = smov 80  }
  0x2a   :  { %4595 = vmatprep.subr.mxu1 %v79_v3  ;;  %s5118_s11 = smov 48   ;;  %s5119_s12 = smov 72  }
  0x2b   :  { %4596 = vmatpush3.msra.mxu1 %v79_v3  ;;  %s5120_s13 = smov 104   ;;  %s5121_s5 = smov 40  }
  0x2c   :  { %4597 = vmatprep.subr.mxu1 %v78_v4 }
  0x2d   :  { %4598 = vmatpush3.msra.mxu1 %v78_v4  ;;  %v499_v4 = vld [vmem:[%s5682_s2] sm:$0xff] }
  0x2e   :  { %4600 = vmatmul.mubr.msk.f32.vlgmr.msra.gmra.mxu1 %vm86_vm0, %v5188_v5  ;;  %4602 = vmatprep.subr.mxu1 %v5109_v6 }
  0x2f   :  { %4604 = vmatprep.mubr.msk.f32.mxu1 %vm5110_vm1, %v5109_v6 }
  0xee   :  { %v4601_v7 = vpop.f32.mrf.mxu1 }
  0xef   :  { %v5202_v11 = vadd.f32 %v4601_v7, %v4322_v8 }
  0xf0   :  { %v159_v9 = vpop.f32.mrf.mxu1 }
  0xf1   :  { %v5198_v10 = vadd.f32 %v4322_v8, %v159_v9 }
  0xf3   :  { %169 = vrot.lane.b32.xlu0 %v5198_v10, %s5111_s23 }
  0xf7   :  { %247 = vrot.lane.b32.xlu0 %v5202_v11, %s5111_s23 }
 0x165   :  { %v170_v12 = vpop.permute.xlu0 %169 }
 0x166   :  { %4603 = vmatpush3.xpose.msk.msra.mxu1 %vm171_vm2, %v170_v12 }
 0x167   :  { %4607 = vmatprep.subr.mxu1 %v5109_v6 }
 0x169   :  { %4605 = vmatmul.mubr.msk.f32.vlgmr.msra.gmra.mxu1 %vm171_vm2, %v5198_v10  ;;  %v248_v13 = vpop.permute.xlu0 %247 }
 0x16a   :  { %4608 = vmatpush3.xpose.msk.msra.mxu1 %vm171_vm2, %v248_v13  ;;  %4609 = vmatprep.mubr.msk.f32.mxu1 %vm5110_vm1, %v5109_v6 }
 0x16b   :  { %4617 = vmatprep.subr.mxu1 %v5109_v6 }
 0x16d   :  { %4610 = vmatmul.mubr.msk.f32.vlgmr.msra.gmra.mxu1 %vm171_vm2, %v5202_v11 }
 0x16e   :  { %4619 = vmatprep.mubr.msk.f32.mxu1 %vm5110_vm1, %v5109_v6 }
 0x229   :  { %v242_v14 = vpop.f32.mrf.mxu1 }
 0x22a   :  { %v323_v15 = vmul.f32 0.35355338, %v242_v14 }
 0x22b   :  { %v4606_v16 = vpop.f32.mrf.mxu1 }
 0x22c   :  { %v325_v17 = vsel %vm171_vm2, %v323_v15, -inf }
 0x22d   :  { %326 = vmax.xlane.f32.xlu1 %v325_v17  ;;  %v319_v18 = vpop.f32.mrf.mxu1 }
 0x22e   :  { %v324_v19 = vmul.f32 0.35355338, %v319_v18 }
 0x22f   :  { %v4611_v20 = vpop.f32.mrf.mxu1 }
 0x230   :  { %v328_v21 = vsel %vm171_vm2, %v324_v19, -inf }
 0x231   :  { %329 = vmax.xlane.f32.xlu1 %v328_v21 }
 0x242   :  { %347 = vrot.lane.b32.xlu1 %v5198_v10, %s5112_s24 }
 0x246   :  { %423 = vrot.lane.b32.xlu1 %v5202_v11, %s5112_s24 }
 0x24a   :  { %502 = vrot.lane.b32.xlu1 %v5198_v10, %s5113_s25 }
 0x24e   :  { %580 = vrot.lane.b32.xlu1 %v5202_v11, %s5113_s25 }
 0x2b6   :  { %v327_v22 = vpop.xlane.xlu1 %326 }
 0x2b7   :  { %v331_v23 = vsub.f32 %v323_v15, %v327_v22 }
 0x2b9   :  { %v333_v24 = vmul.f32 1.442695, %v331_v23 }
 0x2ba   :  { %v330_v25 = vpop.xlane.xlu1 %329 }
 0x2bb   :  { %4938 = vpow2.f32 %v333_v24  ;;  %v332_v26 = vsub.f32 %v324_v19, %v330_v25  ;;  %v832_v19 = vld [vmem:[%s5682_s2 + $0x8] sm:$0xff] }
 0x2bd   :  { %v335_v27 = vmul.f32 1.442695, %v332_v26 }
 0x2be   :  { %v348_v28 = vpop.permute.xlu1 %347 }
 0x2bf   :  { %4940 = vpow2.f32 %v335_v27  ;;  %4613 = vmatpush3.msra.mxu0 %v348_v28 }
 0x2c0   :  { %4622 = vmatprep.subr.mxu0 %v5109_v6 }
 0x2c2   :  { %v424_v29 = vpop.permute.xlu1 %423 }
 0x2c3   :  { %4618 = vmatpush3.msra.mxu1 %v424_v29 }
 0x2c4   :  { %4627 = vmatprep.subr.mxu1 %v5109_v6 }
 0x2c6   :  { %v503_v34 = vpop.permute.xlu1 %502 }
 0x2c8   :  { %v4939_v30 = vpop.eup %4938 }
 0x2c9   :  { %v337_v31 = vsel %vm171_vm2, %v4939_v30, 0.0 }
 0x2ca   :  { %338 = vadd.xlane.f32.xlu0 %v337_v31  ;;  %v581_v35 = vpop.permute.xlu1 %580 }
 0x2cc   :  { %v4941_v32 = vpop.eup %4940 }
 0x2cd   :  { %v340_v33 = vsel %vm171_vm2, %v4941_v32, 0.0 }
 0x2ce   :  { %341 = vadd.xlane.f32.xlu1 %v340_v33 }
 0x2df   :  { %578 = vrot.lane.b32.xlu1 %v5202_v11, %s5114_s26 }
 0x2e0   :  { %500 = vrot.lane.b32.xlu0 %v5198_v10, %s5114_s26 }
 0x353   :  { %v339_v36 = vpop.xlane.xlu0 %338 }
 0x354   :  { %4942 = vrcp.f32 %v339_v36 }
 0x357   :  { %v342_v37 = vpop.xlane.xlu1 %341  ;;  %v501_v42 = vpop.permute.xlu0 %500 }
 0x358   :  { %4944 = vrcp.f32 %v342_v37 }
 0x35b   :  { %v579_v43 = vpop.permute.xlu1 %578 }
 0x361   :  { %v4943_v38 = vpop.eup %4942 }
 0x362   :  { %v344_v39 = vmul.f32 %v4943_v38, %v4939_v30 }
 0x364   :  { %4615 = vmatmul.mubr.msk.f32.vlgmr.msra.gmra.mxu0 %vm171_vm2, %v344_v39 }
 0x365   :  { %v4945_v40 = vpop.eup %4944  ;;  %4623 = vmatpush3.xpose.msk.msra.mxu0 %vm171_vm2, %v503_v34  ;;  %4624 = vmatprep.mubr.msk.f32.mxu0 %vm5110_vm1, %v5109_v6 }
 0x366   :  { %v346_v41 = vmul.f32 %v4945_v40, %v4941_v32  ;;  %4632 = vmatprep.subr.mxu0 %v5109_v6 }
 0x368   :  { %4620 = vmatmul.mubr.msk.f32.vlgmr.msra.gmra.mxu1 %vm171_vm2, %v346_v41  ;;  %4625 = vmatmul.mubr.msk.f32.vlgmr.msra.gmra.mxu0 %vm171_vm2, %v501_v42 }
 0x369   :  { %4628 = vmatpush3.xpose.msk.msra.mxu1 %vm171_vm2, %v581_v35  ;;  %4629 = vmatprep.mubr.msk.f32.mxu1 %vm5110_vm1, %v5109_v6 }
 0x36a   :  { %4637 = vmatprep.subr.mxu1 %v5109_v6  ;;  %4634 = vmatprep.mubr.msk.f32.mxu0 %vm5110_vm1, %v5109_v6 }
 0x36c   :  { %4630 = vmatmul.mubr.msk.f32.vlgmr.msra.gmra.mxu1 %vm171_vm2, %v579_v43 }
 0x36d   :  { %4639 = vmatprep.mubr.msk.f32.mxu1 %vm5110_vm1, %v5109_v6 }
 0x424   :  { %v419_v44 = vpop.f32.mrf.mxu0 }
 0x426   :  { %v4616_v45 = vpop.f32.mrf.mxu0 }
 0x428   :  { %v495_v46 = vpop.f32.mrf.mxu1  ;;  %v574_v47 = vpop.f32.mrf.mxu0 }
 0x429   :  { %v656_v48 = vmul.f32 0.35355338, %v574_v47 }
 0x42a   :  { %v4621_v49 = vpop.f32.mrf.mxu1  ;;  %v4626_v50 = vpop.f32.mrf.mxu0 }
 0x42b   :  { %v658_v51 = vsel %vm171_vm2, %v656_v48, -inf }
 0x42c   :  { %v652_v52 = vpop.f32.mrf.mxu1  ;;  %659 = vmax.xlane.f32.xlu1 %v658_v51 }
 0x42d   :  { %v657_v53 = vmul.f32 0.35355338, %v652_v52 }
 0x42e   :  { %v4631_v54 = vpop.f32.mrf.mxu1 }
 0x42f   :  { %v661_v55 = vsel %vm171_vm2, %v657_v53, -inf }
 0x430   :  { %662 = vmax.xlane.f32.xlu0 %v661_v55 }
 0x446   :  { %756 = vrot.lane.b32.xlu0 %v5202_v11, %s5115_s27 }
 0x44a   :  { %995 = vrot.lane.b32.xlu0 %v5198_v10, %s5116_s28 }
 0x4b5   :  { %v660_v56 = vpop.xlane.xlu1 %659 }
 0x4b6   :  { %v664_v57 = vsub.f32 %v656_v48, %v660_v56 }
 0x4b8   :  { %v666_v58 = vmul.f32 1.442695, %v664_v57  ;;  %v1327_v57 = vld [vmem:[%s5682_s2 + $0x10] sm:$0xff] }
 0x4b9   :  { %v663_v59 = vpop.xlane.xlu0 %662 }
 0x4ba   :  { %4946 = vpow2.f32 %v666_v58  ;;  %v665_v60 = vsub.f32 %v657_v53, %v663_v59 }
 0x4bc   :  { %v668_v61 = vmul.f32 1.442695, %v665_v60 }
 0x4bd   :  { %v757_v62 = vpop.permute.xlu0 %756 }
 0x4be   :  { %4948 = vpow2.f32 %v668_v61  ;;  %4638 = vmatpush3.msra.mxu1 %v757_v62 }
 0x4bf   :  { %4647 = vmatprep.subr.mxu1 %v499_v4 }
 0x4c1   :  { %v996_v24 = vpop.permute.xlu0 %995 }
 0x4c7   :  { %v4947_v63 = vpop.eup %4946 }
 0x4c8   :  { %v670_v0 = vsel %vm171_vm2, %v4947_v63, 0.0 }
 0x4c9   :  { %671 = vadd.xlane.f32.xlu1 %v670_v0 }
 0x4cb   :  { %v4949_v1 = vpop.eup %4948 }
 0x4cc   :  { %v673_v3 = vsel %vm171_vm2, %v4949_v1, 0.0 }
 0x4cd   :  { %674 = vadd.xlane.f32.xlu1 %v673_v3 }
 0x4de   :  { %680 = vrot.lane.b32.xlu1 %v5198_v10, %s5115_s27 }
 0x4e2   :  { %997 = vrot.lane.b32.xlu1 %v5198_v10, %s5117_s29 }
 0x4e6   :  { %1075 = vrot.lane.b32.xlu1 %v5202_v11, %s5117_s29 }
 0x4ea   :  { %1073 = vrot.lane.b32.xlu1 %v5202_v11, %s5116_s28 }
 0x552   :  { %v672_v7 = vpop.xlane.xlu1 %671 }
 0x553   :  { %4950 = vrcp.f32 %v672_v7 }
 0x556   :  { %v675_v8 = vpop.xlane.xlu1 %674 }
 0x557   :  { %4952 = vrcp.f32 %v675_v8 }
 0x55a   :  { %v681_v9 = vpop.permute.xlu1 %680 }
 0x55b   :  { %4633 = vmatpush3.msra.mxu0 %v681_v9 }
 0x55c   :  { %4642 = vmatprep.subr.mxu0 %v832_v19 }
 0x55e   :  { %v998_v14 = vpop.permute.xlu1 %997 }
 0x560   :  { %v4951_v12 = vpop.eup %4950 }
 0x561   :  { %v677_v13 = vmul.f32 %v4951_v12, %v4947_v63 }
 0x562   :  { %v1076_v17 = vpop.permute.xlu1 %1075 }
 0x563   :  { %4635 = vmatmul.mubr.msk.f32.vlgmr.msra.gmra.mxu0 %vm171_vm2, %v677_v13 }
 0x564   :  { %v4953_v15 = vpop.eup %4952  ;;  %4643 = vmatpush3.msra.mxu0 %v832_v19 }
 0x565   :  { %v679_v16 = vmul.f32 %v4953_v15, %v4949_v1  ;;  %4652 = vmatprep.subr.mxu0 %v5109_v6 }
 0x566   :  { %v1074_v18 = vpop.permute.xlu1 %1073 }
 0x567   :  { %4640 = vmatmul.mubr.msk.f32.vlgmr.msra.gmra.mxu1 %vm171_vm2, %v679_v16 }
 0x568   :  { %4649 = vmatprep.mubr.msk.f32.mxu1 %vm171_vm2, %v419_v44  ;;  %4648 = vmatpush3.msra.mxu1 %v499_v4 }
 0x569   :  { %4657 = vmatprep.subr.mxu1 %v5109_v6 }
 0x56b   :  { %4650 = vmatmul.mubr.msk.f32.vlgmr.msra.gmra.mxu1 %vm171_vm2, %v495_v46 }
 0x56c   :  { %4658 = vmatpush3.xpose.msk.msra.mxu1 %vm171_vm2, %v1076_v17  ;;  %4659 = vmatprep.mubr.msk.f32.mxu1 %vm5110_vm1, %v5109_v6 }
 0x56d   :  { %4667 = vmatprep.subr.mxu1 %v5109_v6 }
 0x56f   :  { %4660 = vmatmul.mubr.msk.f32.vlgmr.msra.gmra.mxu1 %vm171_vm2, %v1074_v18 }
 0x570   :  { %4669 = vmatprep.mubr.msk.f32.mxu1 %vm5110_vm1, %v5109_v6 }
 0x623   :  { %v752_v20 = vpop.f32.mrf.mxu0 }
 0x624   :  { %4644 = vmatprep.mubr.msk.f32.mxu0 %vm171_vm2, %v752_v20 }
 0x625   :  { %v4636_v21 = vpop.f32.mrf.mxu0 }
 0x627   :  { %v828_v22 = vpop.f32.mrf.mxu1 }
 0x628   :  { %4645 = vmatmul.mubr.msk.f32.vlgmr.msra.gmra.mxu0 %vm171_vm2, %v828_v22 }
 0x629   :  { %4653 = vmatpush3.xpose.msk.msra.mxu0 %vm171_vm2, %v998_v14  ;;  %v4641_v23 = vpop.f32.mrf.mxu1  ;;  %4654 = vmatprep.mubr.msk.f32.mxu0 %vm5110_vm1, %v5109_v6 }
 0x62a   :  { %4662 = vmatprep.subr.mxu0 %v5109_v6 }
 0x62b   :  { %v5293_v25 = vpop.f32.mrf.mxu1 }
 0x62c   :  { %4655 = vmatmul.mubr.msk.f32.vlgmr.msra.gmra.mxu0 %vm171_vm2, %v996_v24 }
 0x62d   :  { %v5296_v26 = vpop.f32.mrf.mxu1  ;;  %4664 = vmatprep.mubr.msk.f32.mxu0 %vm5110_vm1, %v5109_v6 }
 0x62f   :  { %v1147_v27 = vpop.f32.mrf.mxu1 }
 0x630   :  { %v1152_v28 = vmul.f32 0.35355338, %v1147_v27 }
 0x631   :  { %v4661_v29 = vpop.f32.mrf.mxu1 }
 0x632   :  { %v1156_v30 = vsel %vm171_vm2, %v1152_v28, -inf }
 0x633   :  { %1157 = vmax.xlane.f32.xlu1 %v1156_v30 }
 0x644   :  { %1175 = vrot.lane.b32.xlu1 %v5198_v10, %s5118_s11 }
 0x648   :  { %1413 = vrot.lane.b32.xlu1 %v5198_v10, %s5119_s12 }
 0x64c   :  { %1491 = vrot.lane.b32.xlu1 %v5202_v11, %s5119_s12 }
 0x650   :  { %1489 = vrot.lane.b32.xlu1 %v5202_v11, %s5120_s13 }
 0x6bc   :  { %v1158_v31 = vpop.xlane.xlu1 %1157 }
 0x6bd   :  { %v1160_v33 = vsub.f32 %v1152_v28, %v1158_v31 }
 0x6bf   :  { %v1163_v34 = vmul.f32 1.442695, %v1160_v33 }
 0x6c0   :  { %v1176_v32 = vpop.permute.xlu1 %1175 }
 0x6c1   :  { %4663 = vmatpush3.msra.mxu0 %v1176_v32  ;;  %4954 = vpow2.f32 %v1163_v34 }
 0x6c2   :  { %4672 = vmatprep.subr.mxu0 %v1327_v57 }
 0x6c4   :  { %v1414_v53 = vpop.permute.xlu1 %1413 }
 0x6c8   :  { %v1492_v0 = vpop.permute.xlu1 %1491 }
 0x6cc   :  { %v1490_v4 = vpop.permute.xlu1 %1489 }
 0x6ce   :  { %v4955_v41 = vpop.eup %4954 }
 0x6cf   :  { %v1168_v42 = vsel %vm171_vm2, %v4955_v41, 0.0 }
 0x6e8   :  { %v5309_v35 = vpop.f32.mrf.mxu0 }
 0x6e9   :  { %v992_v14 = vadd.f32 %v5293_v25, %v5309_v35 }
 0x6ea   :  { %v5311_v36 = vpop.f32.mrf.mxu0 }
 0x6eb   :  { %v987_v16 = vadd.f32 %v5296_v26, %v5311_v36 }
 0x6ec   :  { %v1069_v37 = vpop.f32.mrf.mxu0 }
 0x6ed   :  { %v1151_v38 = vmul.f32 0.35355338, %v1069_v37 }
 0x6ee   :  { %v4656_v39 = vpop.f32.mrf.mxu0 }
 0x6ef   :  { %v1153_v40 = vsel %vm171_vm2, %v1151_v38, -inf }
 0x6f0   :  { %1154 = vmax.xlane.f32.xlu0 %v1153_v40  ;;  %v4357_v40 = vld [vmem:[#allocation5 + $0x1] ss:$0 sm:$0xff] }
 0x6f4   :  { %1169 = vadd.xlane.f32.xlu0 %v1168_v42 }
 0x779   :  { %v1155_v43 = vpop.xlane.xlu0 %1154 }
 0x77a   :  { %v1159_v44 = vsub.f32 %v1151_v38, %v1155_v43 }
 0x77c   :  { %v1161_v45 = vmul.f32 1.442695, %v1159_v44 }
 0x77d   :  { %v1170_v48 = vpop.xlane.xlu0 %1169 }
 0x77e   :  { %4956 = vpow2.f32 %v1161_v45 }
 0x77f   :  { %4958 = vrcp.f32 %v1170_v48 }
 0x78b   :  { %v4957_v46 = vpop.eup %4956 }
 0x78c   :  { %v1165_v47 = vsel %vm171_vm2, %v4957_v46, 0.0  ;;  %v4959_v50 = vpop.eup %4958 }
 0x78d   :  { %1166 = vadd.xlane.f32.xlu0 %v1165_v47  ;;  %v1174_v52 = vmul.f32 %v4959_v50, %v4955_v41 }
 0x7a3   :  { %1251 = vrot.lane.b32.xlu0 %v5202_v11, %s5118_s11 }
 0x7a7   :  { %1411 = vrot.lane.b32.xlu0 %v5198_v10, %s5120_s13 }
 0x816   :  { %v1167_v49 = vpop.xlane.xlu0 %1166 }
 0x817   :  { %4960 = vrcp.f32 %v1167_v49 }
 0x81a   :  { %v1252_v51 = vpop.permute.xlu0 %1251 }
 0x81b   :  { %4668 = vmatpush3.msra.mxu1 %v1252_v51 }
 0x81c   :  { %4670 = vmatmul.mubr.msk.f32.vlgmr.msra.gmra.mxu1 %vm171_vm2, %v1174_v52  ;;  %4677 = vmatprep.subr.mxu1 %v5109_v6 }
 0x81d   :  { %4678 = vmatpush3.xpose.msk.msra.mxu1 %vm171_vm2, %v1414_v53  ;;  %4679 = vmatprep.mubr.msk.f32.mxu1 %vm5110_vm1, %v5109_v6 }
 0x81e   :  { %v1412_v54 = vpop.permute.xlu0 %1411  ;;  %4687 = vmatprep.subr.mxu1 %v5109_v6 }
 0x820   :  { %4680 = vmatmul.mubr.msk.f32.vlgmr.msra.gmra.mxu1 %vm171_vm2, %v1412_v54 }
 0x821   :  { %4689 = vmatprep.mubr.msk.f32.mxu1 %vm5110_vm1, %v5109_v6 }
 0x824   :  { %v4961_v55 = vpop.eup %4960 }
 0x825   :  { %v1172_v56 = vmul.f32 %v4961_v55, %v4957_v46 }
 0x827   :  { %4665 = vmatmul.mubr.msk.f32.vlgmr.msra.gmra.mxu0 %vm171_vm2, %v1172_v56 }
 0x828   :  { %4673 = vmatpush3.msra.mxu0 %v1327_v57 }
 0x829   :  { %4682 = vmatprep.subr.mxu0 %v5109_v6 }
 0x8dc   :  { %v1323_v58 = vpop.f32.mrf.mxu1 }
 0x8de   :  { %v4671_v59 = vpop.f32.mrf.mxu1 }
 0x8e0   :  { %v1485_v60 = vpop.f32.mrf.mxu1 }
 0x8e1   :  { %v1567_v61 = vmul.f32 0.35355338, %v1485_v60  ;;  %v1876_v60 = vld [vmem:[%s5683_s3 + $0x10] sm:$0xff] }
 0x8e2   :  { %v4681_v62 = vpop.f32.mrf.mxu1 }
 0x8e3   :  { %v1569_v63 = vsel %vm171_vm2, %v1567_v61, -inf  ;;  %v1874_v62 = vld [vmem:[%s5683_s3] sm:$0xff] }
 0x8e4   :  { %1570 = vmax.xlane.f32.xlu0 %v1569_v63  ;;  %v1972_v63 = vld [vmem:[%s5684_s4 + $0x38] sm:$0xff] }
 0x8e7   :  { %v1247_v1 = vpop.f32.mrf.mxu0 }
 0x8e8   :  { %4674 = vmatprep.mubr.msk.f32.mxu0 %vm171_vm2, %v1247_v1 }
 0x8e9   :  { %v4666_v3 = vpop.f32.mrf.mxu0  ;;  %4675 = vmatmul.mubr.msk.f32.vlgmr.msra.gmra.mxu0 %vm171_vm2, %v1323_v58 }
 0x8ea   :  { %4683 = vmatpush3.xpose.msk.msra.mxu0 %vm171_vm2, %v1492_v0  ;;  %4684 = vmatprep.mubr.msk.f32.mxu0 %vm5110_vm1, %v5109_v6 }
 0x8eb   :  { %4692 = vmatprep.subr.mxu0 %v5109_v6 }
 0x8ed   :  { %4685 = vmatmul.mubr.msk.f32.vlgmr.msra.gmra.mxu0 %vm171_vm2, %v1490_v4 }
 0x8ee   :  { %4694 = vmatprep.mubr.msk.f32.mxu0 %vm5110_vm1, %v5109_v6 }
 0x96d   :  { %v1571_v7 = vpop.xlane.xlu0 %1570 }
 0x96e   :  { %v1575_v8 = vsub.f32 %v1567_v61, %v1571_v7  ;;  %v1875_v61 = vld [vmem:[%s5683_s3 + $0x8] sm:$0xff] }
 0x970   :  { %v1577_v9 = vmul.f32 1.442695, %v1575_v8 }
 0x972   :  { %4962 = vpow2.f32 %v1577_v9 }
 0x97f   :  { %v4963_v12 = vpop.eup %4962 }
 0x980   :  { %v1581_v13 = vsel %vm171_vm2, %v4963_v12, 0.0 }
 0x981   :  { %1582 = vadd.xlane.f32.xlu0 %v1581_v13 }
 0x9a9   :  { %v4676_v15 = vpop.f32.mrf.mxu0 }
 0x9aa   :  { %v1410_v17 = vadd.f32 %v4676_v15, %v992_v14 }
 0x9ab   :  { %v1400_v18 = vpop.f32.mrf.mxu0 }
 0x9ac   :  { %v1409_v19 = vadd.f32 %v1400_v18, %v987_v16 }
 0x9ad   :  { %v1563_v20 = vpop.f32.mrf.mxu0 }
 0x9ae   :  { %v1568_v21 = vmul.f32 0.35355338, %v1563_v20 }
 0x9af   :  { %v4686_v22 = vpop.f32.mrf.mxu0 }
 0x9b0   :  { %v1572_v23 = vsel %vm171_vm2, %v1568_v21, -inf  ;;  %v1970_v22 = vld [vmem:[%s5684_s4 + $0x28] sm:$0xff] }
 0x9b1   :  { %1573 = vmax.xlane.f32.xlu1 %v1572_v23  ;;  %v1969_v23 = vld [vmem:[%s5684_s4 + $0x20] sm:$0xff] }
 0x9c2   :  { %1591 = vrot.lane.b32.xlu1 %v5198_v10, %s5121_s5  ;;  %v1743_v10 = vld [vmem:[%s5682_s2 + $0x18] sm:$0xff] }
 0xa0a   :  { %v1583_v24 = vpop.xlane.xlu0 %1582 }
 0xa0b   :  { %4964 = vrcp.f32 %v1583_v24  ;;  %v1968_v24 = vld [vmem:[%s5684_s4 + $0x18] sm:$0xff] }
 0xa18   :  { %v4965_v27 = vpop.eup %4964 }
 0xa19   :  { %v1588_v30 = vmul.f32 %v4965_v27, %v4963_v12  ;;  %v4358_v12 = vld [vmem:[#allocation5 + $0x4] ss:$0 sm:$0xff]  ;;  %v1966_v27 = vld [vmem:[%s5684_s4 + $0x8] sm:$0xff] }
 0xa3a   :  { %v1574_v25 = vpop.xlane.xlu1 %1573 }
 0xa3b   :  { %v1576_v28 = vsub.f32 %v1568_v21, %v1574_v25  ;;  %v1971_v21 = vld [vmem:[%s5684_s4 + $0x30] sm:$0xff] }
 0xa3c   :  { %v1967_v25 = vld [vmem:[%s5684_s4 + $0x10] sm:$0xff] }
 0xa3d   :  { %v1579_v29 = vmul.f32 1.442695, %v1576_v28  ;;  %v1965_v28 = vld [vmem:[%s5684_s4] sm:$0xff] }
 0xa3e   :  { %v1592_v26 = vpop.permute.xlu1 %1591 }
 0xa3f   :  { %4966 = vpow2.f32 %v1579_v29  ;;  %4688 = vmatpush3.msra.mxu1 %v1592_v26  ;;  %v4360_v29 = vld [vmem:[#allocation5 + $0x2] ss:$0 sm:$0xff] }
 0xa40   :  { %4690 = vmatmul.mubr.msk.f32.vlgmr.msra.gmra.mxu1 %vm171_vm2, %v1588_v30  ;;  %4697 = vmatprep.subr.mxu1 %v1743_v10 }
 0xa41   :  { %4698 = vmatpush3.msra.mxu1 %v1743_v10 }
 0xa4c   :  { %v4967_v31 = vpop.eup %4966 }
 0xa4d   :  { %v1584_v32 = vsel %vm171_vm2, %v4967_v31, 0.0 }
 0xa4e   :  { %1585 = vadd.xlane.f32.xlu0 %v1584_v32 }
 0xa64   :  { %1667 = vrot.lane.b32.xlu0 %v5202_v11, %s5121_s5 }
 0xad7   :  { %v1586_v33 = vpop.xlane.xlu0 %1585 }
 0xad8   :  { %4968 = vrcp.f32 %v1586_v33 }
 0xadb   :  { %v1668_v34 = vpop.permute.xlu0 %1667 }
 0xadc   :  { %4693 = vmatpush3.msra.mxu0 %v1668_v34  ;;  %v4363_v34 = vld [vmem:[#allocation5 + $0x3] ss:$0 sm:$0xff] }
 0xae5   :  { %v4969_v35 = vpop.eup %4968 }
 0xae6   :  { %v1590_v36 = vmul.f32 %v4969_v35, %v4967_v31 }
 0xae8   :  { %4695 = vmatmul.mubr.msk.f32.vlgmr.msra.gmra.mxu0 %vm171_vm2, %v1590_v36 }
 0xb00   :  { %v1663_v37 = vpop.f32.mrf.mxu1 }
 0xb01   :  { %4699 = vmatprep.mubr.msk.f32.mxu1 %vm171_vm2, %v1663_v37 }
 0xb02   :  { %v4691_v38 = vpop.f32.mrf.mxu1 }
 0xba8   :  { %v1739_v39 = vpop.f32.mrf.mxu0 }
 0xba9   :  { %4700 = vmatmul.mubr.msk.f32.vlgmr.msra.gmra.mxu1 %vm171_vm2, %v1739_v39 }
 0xbaa   :  { %v4696_v11 = vpop.f32.mrf.mxu0 }
 0xc69   :  { %v4701_v41 = vpop.f32.mrf.mxu1 }
 0xc6a   :  { %v1826_v42 = vadd.f32 %v4701_v41, %v1410_v17  ;;  %v4359_v17 = vld [vmem:[#allocation5 + $0x5] ss:$0 sm:$0xff] }
 0xc6b   :  { %v1816_v43 = vpop.f32.mrf.mxu1 }
 0xc6c   :  { %v1832_v44 = vadd.f32 %v4357_v40, %v1826_v42  ;;  %v1825_v45 = vadd.f32 %v1816_v43, %v1409_v19 }
 0xc6e   :  { %v1831_v46 = vadd.f32 %v4357_v40, %v1825_v45  ;;  %v1834_v47 = vadd.f32 %v1832_v44, %v5188_v5 }
 0xc70   :  { %v1838_v48 = vsel %vm86_vm0, %v1834_v47, 0.0  ;;  %v1833_v49 = vadd.f32 %v1831_v46, %v5178_v2  ;;  %v1877_v2 = vld [vmem:[%s5683_s3 + $0x18] sm:$0xff] }
 0xc71   :  { %1839 = vadd.xlane.f32.xlu0 %v1838_v48  ;;  %4702 = vmatprep.subr.mxu1 %v1877_v2 }
 0xc72   :  { %v1835_v50 = vsel %vm86_vm0, %v1833_v49, 0.0  ;;  %4703 = vmatpush3.msra.mxu1 %v1877_v2 }
 0xc73   :  { %1836 = vadd.xlane.f32.xlu1 %v1835_v50  ;;  %4704 = vmatprep.subr.mxu1 %v1876_v60 }
 0xc74   :  { %4705 = vmatpush3.msra.mxu1 %v1876_v60 }
 0xc75   :  { %4706 = vmatprep.subr.mxu1 %v1875_v61 }
 0xc76   :  { %4707 = vmatpush3.msra.mxu1 %v1875_v61  ;;  %v4366_v61 = vld [vmem:[#allocation5 + $0x6] ss:$0 sm:$0xff] }
 0xc77   :  { %4708 = vmatprep.subr.mxu1 %v1874_v62 }
 0xc78   :  { %4709 = vmatpush3.msra.mxu1 %v1874_v62 }
 0xc79   :  { %4713 = vmatprep.subr.mxu1 %v1972_v63 }
 0xcfa   :  { %v1840_v51 = vpop.xlane.xlu0 %1839 }
 0xcfb   :  { %v1843_v52 = vmul.f32 0.03125, %v1840_v51 }
 0xcfc   :  { %v1837_v53 = vpop.xlane.xlu1 %1836 }
 0xcfd   :  { %v1845_v54 = vsub.f32 %v1834_v47, %v1843_v52  ;;  %v1842_v55 = vmul.f32 0.03125, %v1837_v53  ;;  %v4371_v52 = vld [vmem:[%s5681_s1 + $0x38] sm:$0xff]  ;;  %v4370_v53 = vld [vmem:[%s5681_s1 + $0x30] sm:$0xff] }
 0xcfe   :  { %4732 = vmatprep.subr.mxu0 %v4371_v52 }
 0xcff   :  { %v1844_v56 = vsub.f32 %v1833_v49, %v1842_v55  ;;  %v1847_v57 = vmul.f32 %v1845_v54, %v1845_v54  ;;  %4733 = vmatpush3.msra.mxu0 %v4371_v52  ;;  %v4368_v55 = vld [vmem:[%s5681_s1 + $0x20] sm:$0xff] }
 0xd00   :  { %4734 = vmatprep.subr.mxu0 %v4370_v53 }
 0xd01   :  { %v1851_v58 = vsel %vm86_vm0, %v1847_v57, 0.0  ;;  %v1846_v59 = vmul.f32 %v1844_v56, %v1844_v56  ;;  %4735 = vmatpush3.msra.mxu0 %v4370_v53 }
 0xd02   :  { %1852 = vadd.xlane.f32.xlu0 %v1851_v58 }
 0xd03   :  { %v1848_v5 = vsel %vm86_vm0, %v1846_v59, 0.0 }
 0xd04   :  { %1849 = vadd.xlane.f32.xlu1 %v1848_v5 }
 0xd8b   :  { %v1853_v0 = vpop.xlane.xlu0 %1852 }
 0xd8c   :  { %v1855_v1 = vmul.f32 0.03125, %v1853_v0 }
 0xd8d   :  { %v1850_v3 = vpop.xlane.xlu1 %1849 }
 0xd8e   :  { %v1857_v4 = vadd.f32 1e-05, %v1855_v1  ;;  %v1854_v7 = vmul.f32 0.03125, %v1850_v3  ;;  %v4367_v3 = vld [vmem:[#allocation5 + $0x7] ss:$0 sm:$0xff] }
 0xd90   :  { %4970 = vrsqrt.f32 %v1857_v4  ;;  %v1856_v8 = vadd.f32 1e-05, %v1854_v7 }
 0xd92   :  { %4972 = vrsqrt.f32 %v1856_v8 }
 0xd9d   :  { %v4971_v9 = vpop.eup %4970 }
 0xd9e   :  { %v1861_v13 = vmul.f32 %v4971_v9, %v1845_v54  ;;  %v4369_v54 = vld [vmem:[%s5681_s1 + $0x28] sm:$0xff]  ;;  %v4372_v9 = vld [vmem:[#allocation5 + $0x8] ss:$0 sm:$0xff] }
 0xd9f   :  { %v4973_v14 = vpop.eup %4972  ;;  %4736 = vmatprep.subr.mxu0 %v4369_v54 }
 0xda0   :  { %v1860_v15 = vmul.f32 %v4973_v14, %v1844_v56  ;;  %v1867_v16 = vmul.f32 %v4358_v12, %v1861_v13  ;;  %4737 = vmatpush3.msra.mxu0 %v4369_v54 }
 0xda1   :  { %4738 = vmatprep.subr.mxu0 %v4368_v55 }
 0xda2   :  { %v1866_v18 = vmul.f32 %v4358_v12, %v1860_v15  ;;  %v1873_v20 = vadd.f32 %v4359_v17, %v1867_v16  ;;  %4739 = vmatpush3.msra.mxu0 %v4368_v55 }
 0xda3   :  { %4743 = vmatprep.subr.mxu0 %v5109_v6 }
 0xda4   :  { %v1872_v19 = vadd.f32 %v4359_v17, %v1866_v18 }
 0xda6   :  { %4710 = vmatprep.mubr.msk.f32.mxu1 %vm86_vm0, %v1872_v19 }
 0xda7   :  { %4711 = vmatmul.mubr.msk.f32.vlgmr.msra.gmra.mxu1 %vm86_vm0, %v1873_v20 }
 0xda8   :  { %4714 = vmatpush3.msra.mxu1 %v1972_v63 }
 0xda9   :  { %4715 = vmatprep.subr.mxu1 %v1971_v21 }
 0xdaa   :  { %4716 = vmatpush3.msra.mxu1 %v1971_v21 }
 0xdab   :  { %4717 = vmatprep.subr.mxu1 %v1970_v22 }
 0xdac   :  { %4718 = vmatpush3.msra.mxu1 %v1970_v22 }
 0xdad   :  { %4719 = vmatprep.subr.mxu1 %v1969_v23 }
 0xdae   :  { %4720 = vmatpush3.msra.mxu1 %v1969_v23 }
 0xdaf   :  { %4721 = vmatprep.subr.mxu1 %v1968_v24 }
 0xdb0   :  { %4722 = vmatpush3.msra.mxu1 %v1968_v24 }
 0xdb1   :  { %4723 = vmatprep.subr.mxu1 %v1967_v25 }
 0xdb2   :  { %4724 = vmatpush3.msra.mxu1 %v1967_v25 }
 0xdb3   :  { %4725 = vmatprep.subr.mxu1 %v1966_v27 }
 0xdb4   :  { %4726 = vmatpush3.msra.mxu1 %v1966_v27 }
 0xdb5   :  { %4727 = vmatprep.subr.mxu1 %v1965_v28 }
 0xdb6   :  { %4728 = vmatpush3.msra.mxu1 %v1965_v28 }
 0xdb7   :  { %4748 = vmatprep.subr.mxu1 %v5109_v6 }
 0xe67   :  { %v4712_v26 = vpop.f32.mrf.mxu1 }
 0xe68   :  { %v1960_v30 = vadd.f32 %v4712_v26, %v4360_v29 }
 0xe69   :  { %v1954_v31 = vpop.f32.mrf.mxu1 }
 0xe6a   :  { %v1955_v32 = vadd.f32 %v4360_v29, %v1954_v31  ;;  %v1964_v33 = vmax.f32 %v1960_v30, 0.0 }
 0xe6c   :  { %v1963_v10 = vmax.f32 %v1955_v32, 0.0 }
 0xe6e   :  { %4729 = vmatprep.mubr.msk.f32.mxu1 %vm1977_vm3, %v1963_v10 }
 0xe6f   :  { %4730 = vmatmul.mubr.msk.f32.vlgmr.msra.gmra.mxu1 %vm1977_vm3, %v1964_v33 }
 0xe70   :  { %4750 = vmatprep.mubr.msk.f32.mxu1 %vm5110_vm1, %v5109_v6 }
 0xf2f   :  { %v4731_v35 = vpop.f32.mrf.mxu1 }
 0xf30   :  { %v2056_v36 = vadd.f32 %v4731_v35, %v4363_v34 }
 0xf31   :  { %v2050_v37 = vpop.f32.mrf.mxu1 }
 0xf32   :  { %v2051_v38 = vadd.f32 %v4363_v34, %v2050_v37  ;;  %v2060_v39 = vadd.f32 %v2056_v36, %v1873_v20 }
 0xf34   :  { %v2064_v11 = vsel %vm86_vm0, %v2060_v39, 0.0  ;;  %v2059_v40 = vadd.f32 %v2051_v38, %v1872_v19 }
 0xf35   :  { %2065 = vadd.xlane.f32.xlu0 %v2064_v11 }
 0xf36   :  { %v2061_v41 = vsel %vm86_vm0, %v2059_v40, 0.0 }
 0xf37   :  { %2062 = vadd.xlane.f32.xlu1 %v2061_v41 }
 0xfbe   :  { %v2066_v42 = vpop.xlane.xlu0 %2065 }
 0xfbf   :  { %v2068_v43 = vmul.f32 0.03125, %v2066_v42 }
 0xfc0   :  { %v2063_v44 = vpop.xlane.xlu1 %2062 }
 0xfc1   :  { %v2070_v45 = vsub.f32 %v2060_v39, %v2068_v43  ;;  %v2067_v46 = vmul.f32 0.03125, %v2063_v44 }
 0xfc3   :  { %v2069_v47 = vsub.f32 %v2059_v40, %v2067_v46  ;;  %v2072_v48 = vmul.f32 %v2070_v45, %v2070_v45 }
 0xfc5   :  { %v2076_v49 = vsel %vm86_vm0, %v2072_v48, 0.0  ;;  %v2071_v50 = vmul.f32 %v2069_v47, %v2069_v47 }
 0xfc6   :  { %2077 = vadd.xlane.f32.xlu0 %v2076_v49 }
 0xfc7   :  { %v2073_v51 = vsel %vm86_vm0, %v2071_v50, 0.0 }
 0xfc8   :  { %2074 = vadd.xlane.f32.xlu1 %v2073_v51 }
0x104f   :  { %v2078_v56 = vpop.xlane.xlu0 %2077 }
0x1050   :  { %v2080_v57 = vmul.f32 0.03125, %v2078_v56 }
0x1051   :  { %v2075_v58 = vpop.xlane.xlu1 %2074 }
0x1052   :  { %v2082_v59 = vadd.f32 1e-05, %v2080_v57  ;;  %v2079_v5 = vmul.f32 0.03125, %v2075_v58 }
0x1054   :  { %4974 = vrsqrt.f32 %v2082_v59  ;;  %v2081_v2 = vadd.f32 1e-05, %v2079_v5 }
0x1056   :  { %4976 = vrsqrt.f32 %v2081_v2 }
0x1061   :  { %v4975_v60 = vpop.eup %4974 }
0x1062   :  { %v2086_v62 = vmul.f32 %v4975_v60, %v2070_v45 }
0x1063   :  { %v4977_v63 = vpop.eup %4976 }
0x1064   :  { %v2085_v0 = vmul.f32 %v4977_v63, %v2069_v47  ;;  %v2092_v1 = vmul.f32 %v4366_v61, %v2086_v62 }
0x1066   :  { %v2091_v4 = vmul.f32 %v4366_v61, %v2085_v0  ;;  %v5430_v8 = vadd.f32 %v4367_v3, %v2092_v1 }
0x1068   :  { %v5428_v7 = vadd.f32 %v4367_v3, %v2091_v4 }
0x106a   :  { %4740 = vmatprep.mubr.msk.f32.mxu0 %vm86_vm0, %v5428_v7 }
0x106b   :  { %4741 = vmatmul.mubr.msk.f32.vlgmr.msra.gmra.mxu0 %vm86_vm0, %v5430_v8 }
0x106c   :  { %4745 = vmatprep.mubr.msk.f32.mxu0 %vm5110_vm1, %v5109_v6 }
0x112b   :  { %v4742_v12 = vpop.f32.mrf.mxu0 }
0x112c   :  { %v5438_v13 = vadd.f32 %v4742_v12, %v4372_v9  ;;  %v4381_v12 = vld [vmem:[%s5682_s2 + $0x20] sm:$0xff] }
0x112d   :  { %v2189_v14 = vpop.f32.mrf.mxu0 }
0x112e   :  { %v5440_v15 = vadd.f32 %v4372_v9, %v2189_v14  ;;  %2276 = vrot.lane.b32.xlu0 %v5438_v13, %s5111_s23 }
0x1130   :  { %2199 = vrot.lane.b32.xlu1 %v5440_v15, %s5111_s23 }
0x11a0   :  { %v2277_v16 = vpop.permute.xlu0 %2276 }
0x11a1   :  { %4749 = vmatpush3.xpose.msk.msra.mxu1 %vm171_vm2, %v2277_v16 }
0x11a2   :  { %v2200_v17 = vpop.permute.xlu1 %2199  ;;  %4758 = vmatprep.subr.mxu1 %v5109_v6 }
0x11a3   :  { %4744 = vmatpush3.xpose.msk.msra.mxu0 %vm171_vm2, %v2200_v17 }
0x11a4   :  { %4751 = vmatmul.mubr.msk.f32.vlgmr.msra.gmra.mxu1 %vm171_vm2, %v5438_v13  ;;  %4753 = vmatprep.subr.mxu0 %v5109_v6 }
0x11a5   :  { %4760 = vmatprep.mubr.msk.f32.mxu1 %vm5110_vm1, %v5109_v6 }
0x11a6   :  { %4746 = vmatmul.mubr.msk.f32.vlgmr.msra.gmra.mxu0 %vm171_vm2, %v5440_v15 }
0x11a7   :  { %4755 = vmatprep.mubr.msk.f32.mxu0 %vm5110_vm1, %v5109_v6 }
0x1264   :  { %v2348_v18 = vpop.f32.mrf.mxu1 }
0x1265   :  { %v2353_v19 = vmul.f32 0.35355338, %v2348_v18 }
0x1266   :  { %v2271_v20 = vpop.f32.mrf.mxu0  ;;  %v4752_v21 = vpop.f32.mrf.mxu1 }
0x1267   :  { %v2352_v22 = vmul.f32 0.35355338, %v2271_v20  ;;  %v2357_v23 = vsel %vm171_vm2, %v2353_v19, -inf }
0x1268   :  { %2358 = vmax.xlane.f32.xlu0 %v2357_v23  ;;  %v4747_v24 = vpop.f32.mrf.mxu0  ;;  %v4388_v23 = vld [vmem:[%s5682_s2 + $0x28] sm:$0xff] }
0x1269   :  { %v2354_v25 = vsel %vm171_vm2, %v2352_v22, -inf }
0x126a   :  { %2355 = vmax.xlane.f32.xlu1 %v2354_v25 }
0x127b   :  { %2376 = vrot.lane.b32.xlu1 %v5440_v15, %s5112_s24 }
0x127e   :  { %2452 = vrot.lane.b32.xlu0 %v5438_v13, %s5112_s24 }
0x127f   :  { %2532 = vrot.lane.b32.xlu1 %v5440_v15, %s5113_s25 }
0x1283   :  { %2610 = vrot.lane.b32.xlu1 %v5438_v13, %s5113_s25 }
0x12f1   :  { %v2359_v27 = vpop.xlane.xlu0 %2358 }
0x12f2   :  { %v2361_v28 = vsub.f32 %v2353_v19, %v2359_v27 }
0x12f3   :  { %v2356_v29 = vpop.xlane.xlu1 %2355 }
0x12f4   :  { %v2364_v26 = vmul.f32 1.442695, %v2361_v28  ;;  %v2360_v30 = vsub.f32 %v2352_v22, %v2356_v29 }
0x12f5   :  { %v2453_v31 = vpop.permute.xlu0 %2452 }
0x12f6   :  { %4978 = vpow2.f32 %v2364_v26  ;;  %v2362_v32 = vmul.f32 1.442695, %v2360_v30  ;;  %4759 = vmatpush3.msra.mxu1 %v2453_v31 }
0x12f7   :  { %v2377_v10 = vpop.permute.xlu1 %2376  ;;  %4768 = vmatprep.subr.mxu1 %v5109_v6 }
0x12f8   :  { %4980 = vpow2.f32 %v2362_v32  ;;  %4754 = vmatpush3.msra.mxu0 %v2377_v10 }
0x12f9   :  { %4763 = vmatprep.subr.mxu0 %v5109_v6 }
0x12fb   :  { %v2533_v37 = vpop.permute.xlu1 %2532 }
0x12ff   :  { %v2611_v38 = vpop.permute.xlu1 %2610 }
0x1303   :  { %v4979_v33 = vpop.eup %4978 }
0x1304   :  { %v2369_v34 = vsel %vm171_vm2, %v4979_v33, 0.0 }
0x1305   :  { %v4981_v35 = vpop.eup %4980  ;;  %2370 = vadd.xlane.f32.xlu0 %v2369_v34 }
0x1306   :  { %v2366_v36 = vsel %vm171_vm2, %v4981_v35, 0.0 }
0x1307   :  { %2367 = vadd.xlane.f32.xlu1 %v2366_v36 }
0x1318   :  { %2608 = vrot.lane.b32.xlu1 %v5438_v13, %s5114_s26 }
0x131b   :  { %2530 = vrot.lane.b32.xlu0 %v5440_v15, %s5114_s26 }
0x138e   :  { %v2371_v39 = vpop.xlane.xlu0 %2370 }
0x138f   :  { %4982 = vrcp.f32 %v2371_v39 }
0x1390   :  { %v2368_v11 = vpop.xlane.xlu1 %2367 }
0x1391   :  { %4984 = vrcp.f32 %v2368_v11 }
0x1392   :  { %v2531_v45 = vpop.permute.xlu0 %2530 }
0x1394   :  { %v2609_v44 = vpop.permute.xlu1 %2608 }
0x139c   :  { %v4983_v40 = vpop.eup %4982 }
0x139d   :  { %v2375_v41 = vmul.f32 %v4983_v40, %v4979_v33 }
0x139e   :  { %v4985_v42 = vpop.eup %4984 }
0x139f   :  { %4761 = vmatmul.mubr.msk.f32.vlgmr.msra.gmra.mxu1 %vm171_vm2, %v2375_v41  ;;  %v2373_v43 = vmul.f32 %v4985_v42, %v4981_v35 }
0x13a0   :  { %4769 = vmatpush3.xpose.msk.msra.mxu1 %vm171_vm2, %v2611_v38  ;;  %4770 = vmatprep.mubr.msk.f32.mxu1 %vm5110_vm1, %v5109_v6 }
0x13a1   :  { %4756 = vmatmul.mubr.msk.f32.vlgmr.msra.gmra.mxu0 %vm171_vm2, %v2373_v43  ;;  %4778 = vmatprep.subr.mxu1 %v5109_v6 }
0x13a2   :  { %4764 = vmatpush3.xpose.msk.msra.mxu0 %vm171_vm2, %v2533_v37  ;;  %4765 = vmatprep.mubr.msk.f32.mxu0 %vm5110_vm1, %v5109_v6 }
0x13a3   :  { %4771 = vmatmul.mubr.msk.f32.vlgmr.msra.gmra.mxu1 %vm171_vm2, %v2609_v44  ;;  %4773 = vmatprep.subr.mxu0 %v5109_v6 }
0x13a4   :  { %4780 = vmatprep.mubr.msk.f32.mxu1 %vm5110_vm1, %v5109_v6 }
0x13a5   :  { %4766 = vmatmul.mubr.msk.f32.vlgmr.msra.gmra.mxu0 %vm171_vm2, %v2531_v45 }
0x13a6   :  { %4775 = vmatprep.mubr.msk.f32.mxu0 %vm5110_vm1, %v5109_v6 }
0x145f   :  { %v2524_v46 = vpop.f32.mrf.mxu1 }
0x1461   :  { %v2448_v47 = vpop.f32.mrf.mxu0  ;;  %v4762_v48 = vpop.f32.mrf.mxu1 }
0x1463   :  { %v4757_v49 = vpop.f32.mrf.mxu0  ;;  %v2682_v50 = vpop.f32.mrf.mxu1 }
0x1464   :  { %v2687_v51 = vmul.f32 0.35355338, %v2682_v50 }
0x1465   :  { %v2604_v52 = vpop.f32.mrf.mxu0  ;;  %v4772_v53 = vpop.f32.mrf.mxu1 }
0x1466   :  { %v2686_v54 = vmul.f32 0.35355338, %v2604_v52  ;;  %v2691_v55 = vsel %vm171_vm2, %v2687_v51, -inf }
0x1467   :  { %2692 = vmax.xlane.f32.xlu1 %v2691_v55  ;;  %v4767_v56 = vpop.f32.mrf.mxu0 }
0x1468   :  { %v2688_v57 = vsel %vm171_vm2, %v2686_v54, -inf }
0x1469   :  { %2689 = vmax.xlane.f32.xlu0 %v2688_v57 }
0x1478   :  { %2710 = vrot.lane.b32.xlu1 %v5440_v15, %s5115_s27 }
0x147c   :  { %3027 = vrot.lane.b32.xlu1 %v5440_v15, %s5117_s29 }
0x1480   :  { %3105 = vrot.lane.b32.xlu1 %v5438_v13, %s5117_s29 }
0x1484   :  { %3103 = vrot.lane.b32.xlu1 %v5438_v13, %s5116_s28 }
0x14f0   :  { %v2693_v58 = vpop.xlane.xlu1 %2692 }
0x14f1   :  { %v2695_v59 = vsub.f32 %v2687_v51, %v2693_v58 }
0x14f2   :  { %v2690_v5 = vpop.xlane.xlu0 %2689 }
0x14f3   :  { %v2698_v2 = vmul.f32 1.442695, %v2695_v59  ;;  %v2694_v60 = vsub.f32 %v2686_v54, %v2690_v5  ;;  %v4399_v59 = vld [vmem:[%s5682_s2 + $0x30] sm:$0xff] }
0x14f4   :  { %v2711_v61 = vpop.permute.xlu1 %2710 }
0x14f5   :  { %4986 = vpow2.f32 %v2698_v2  ;;  %v2696_v62 = vmul.f32 1.442695, %v2694_v60  ;;  %4774 = vmatpush3.msra.mxu0 %v2711_v61 }
0x14f6   :  { %4783 = vmatprep.subr.mxu0 %v4388_v23 }
0x14f7   :  { %4988 = vpow2.f32 %v2696_v62 }
0x14f8   :  { %v3028_v16 = vpop.permute.xlu1 %3027 }
0x14fc   :  { %v3106_v20 = vpop.permute.xlu1 %3105 }
0x1500   :  { %v3104_v22 = vpop.permute.xlu1 %3103 }
0x1502   :  { %v4987_v63 = vpop.eup %4986 }
0x1503   :  { %v2703_v0 = vsel %vm171_vm2, %v4987_v63, 0.0 }
0x1504   :  { %v4989_v1 = vpop.eup %4988  ;;  %2704 = vadd.xlane.f32.xlu0 %v2703_v0 }
0x1505   :  { %v2700_v3 = vsel %vm171_vm2, %v4989_v1, 0.0 }
0x1508   :  { %2701 = vadd.xlane.f32.xlu0 %v2700_v3 }
0x151e   :  { %2786 = vrot.lane.b32.xlu0 %v5438_v13, %s5115_s27 }
0x1522   :  { %3025 = vrot.lane.b32.xlu0 %v5440_v15, %s5116_s28 }
0x158d   :  { %v2705_v4 = vpop.xlane.xlu0 %2704 }
0x158e   :  { %4990 = vrcp.f32 %v2705_v4 }
0x1591   :  { %v2702_v9 = vpop.xlane.xlu0 %2701 }
0x1592   :  { %4992 = vrcp.f32 %v2702_v9 }
0x1595   :  { %v2787_v14 = vpop.permute.xlu0 %2786 }
0x1596   :  { %4779 = vmatpush3.msra.mxu1 %v2787_v14 }
0x1597   :  { %4788 = vmatprep.subr.mxu1 %v4381_v12 }
0x1599   :  { %v3026_v31 = vpop.permute.xlu0 %3025 }
0x159b   :  { %v4991_v17 = vpop.eup %4990 }
0x159c   :  { %v2709_v18 = vmul.f32 %v4991_v17, %v4987_v63 }
0x159e   :  { %4781 = vmatmul.mubr.msk.f32.vlgmr.msra.gmra.mxu1 %vm171_vm2, %v2709_v18 }
0x159f   :  { %v4993_v19 = vpop.eup %4992  ;;  %4790 = vmatprep.mubr.msk.f32.mxu1 %vm171_vm2, %v2448_v47  ;;  %4789 = vmatpush3.msra.mxu1 %v4381_v12 }
0x15a0   :  { %4798 = vmatprep.subr.mxu1 %v5109_v6  ;;  %v2707_v21 = vmul.f32 %v4993_v19, %v4989_v1 }
0x15a2   :  { %4776 = vmatmul.mubr.msk.f32.vlgmr.msra.gmra.mxu0 %vm171_vm2, %v2707_v21  ;;  %4791 = vmatmul.mubr.msk.f32.vlgmr.msra.gmra.mxu1 %vm171_vm2, %v2524_v46 }
0x15a3   :  { %4799 = vmatpush3.xpose.msk.msra.mxu1 %vm171_vm2, %v3106_v20  ;;  %4800 = vmatprep.mubr.msk.f32.mxu1 %vm5110_vm1, %v5109_v6 }
0x15a4   :  { %4808 = vmatprep.subr.mxu1 %v5109_v6  ;;  %4784 = vmatpush3.msra.mxu0 %v4388_v23 }
0x15a5   :  { %4793 = vmatprep.subr.mxu0 %v5109_v6 }
0x15a6   :  { %4801 = vmatmul.mubr.msk.f32.vlgmr.msra.gmra.mxu1 %vm171_vm2, %v3104_v22 }
0x15a7   :  { %4810 = vmatprep.mubr.msk.f32.mxu1 %vm5110_vm1, %v5109_v6 }
0x165e   :  { %v2858_v24 = vpop.f32.mrf.mxu1 }
0x1660   :  { %v4782_v25 = vpop.f32.mrf.mxu1 }
0x1662   :  { %v2782_v27 = vpop.f32.mrf.mxu0  ;;  %v5527_v28 = vpop.f32.mrf.mxu1 }
0x1663   :  { %4785 = vmatprep.mubr.msk.f32.mxu0 %vm171_vm2, %v2782_v27 }
0x1664   :  { %v4777_v29 = vpop.f32.mrf.mxu0  ;;  %4786 = vmatmul.mubr.msk.f32.vlgmr.msra.gmra.mxu0 %vm171_vm2, %v2858_v24  ;;  %v5531_v26 = vpop.f32.mrf.mxu1 }
0x1665   :  { %4794 = vmatpush3.xpose.msk.msra.mxu0 %vm171_vm2, %v3028_v16  ;;  %4795 = vmatprep.mubr.msk.f32.mxu0 %vm5110_vm1, %v5109_v6 }
0x1666   :  { %v3177_v30 = vpop.f32.mrf.mxu1  ;;  %4803 = vmatprep.subr.mxu0 %v5109_v6 }
0x1667   :  { %v3182_v32 = vmul.f32 0.35355338, %v3177_v30 }
0x1668   :  { %4796 = vmatmul.mubr.msk.f32.vlgmr.msra.gmra.mxu0 %vm171_vm2, %v3026_v31  ;;  %v4802_v10 = vpop.f32.mrf.mxu1 }
0x1669   :  { %v3186_v33 = vsel %vm171_vm2, %v3182_v32, -inf  ;;  %4805 = vmatprep.mubr.msk.f32.mxu0 %vm5110_vm1, %v5109_v6 }
0x166a   :  { %3187 = vmax.xlane.f32.xlu1 %v3186_v33 }
0x167b   :  { %3205 = vrot.lane.b32.xlu1 %v5440_v15, %s5118_s11 }
0x167f   :  { %3443 = vrot.lane.b32.xlu1 %v5440_v15, %s5119_s12 }
0x1683   :  { %3521 = vrot.lane.b32.xlu1 %v5438_v13, %s5119_s12 }
0x1687   :  { %3519 = vrot.lane.b32.xlu1 %v5438_v13, %s5120_s13 }
0x16f3   :  { %v3188_v34 = vpop.xlane.xlu1 %3187 }
0x16f4   :  { %v3190_v36 = vsub.f32 %v3182_v32, %v3188_v34 }
0x16f6   :  { %v3193_v37 = vmul.f32 1.442695, %v3190_v36 }
0x16f7   :  { %v3206_v35 = vpop.permute.xlu1 %3205 }
0x16f8   :  { %4804 = vmatpush3.msra.mxu0 %v3206_v35  ;;  %4994 = vpow2.f32 %v3193_v37 }
0x16f9   :  { %4813 = vmatprep.subr.mxu0 %v4399_v59 }
0x16fb   :  { %v3444_v55 = vpop.permute.xlu1 %3443 }
0x16ff   :  { %v3522_v0 = vpop.permute.xlu1 %3521 }
0x1703   :  { %v3520_v4 = vpop.permute.xlu1 %3519 }
0x1705   :  { %v4995_v43 = vpop.eup %4994 }
0x1706   :  { %v3198_v44 = vsel %vm171_vm2, %v4995_v43, 0.0 }
0x1724   :  { %v5549_v38 = vpop.f32.mrf.mxu0 }
0x1725   :  { %v3022_v18 = vadd.f32 %v5527_v28, %v5549_v38 }
0x1726   :  { %v5551_v39 = vpop.f32.mrf.mxu0 }
0x1727   :  { %v3017_v20 = vadd.f32 %v5531_v26, %v5551_v39 }
0x1728   :  { %v3099_v11 = vpop.f32.mrf.mxu0 }
0x1729   :  { %v3181_v40 = vmul.f32 0.35355338, %v3099_v11 }
0x172a   :  { %v4797_v41 = vpop.f32.mrf.mxu0 }
0x172b   :  { %v3183_v42 = vsel %vm171_vm2, %v3181_v40, -inf }
0x172c   :  { %3184 = vmax.xlane.f32.xlu0 %v3183_v42  ;;  %v4411_v42 = vld [vmem:[#allocation5 + $0x9] ss:$0 sm:$0xff] }
0x1730   :  { %3199 = vadd.xlane.f32.xlu0 %v3198_v44 }
0x17b5   :  { %v3185_v45 = vpop.xlane.xlu0 %3184 }
0x17b6   :  { %v3189_v46 = vsub.f32 %v3181_v40, %v3185_v45 }
0x17b8   :  { %v3191_v47 = vmul.f32 1.442695, %v3189_v46 }
0x17b9   :  { %v3200_v50 = vpop.xlane.xlu0 %3199 }
0x17ba   :  { %4996 = vpow2.f32 %v3191_v47 }
0x17bb   :  { %4998 = vrcp.f32 %v3200_v50 }
0x17c7   :  { %v4997_v48 = vpop.eup %4996 }
0x17c8   :  { %v3195_v49 = vsel %vm171_vm2, %v4997_v48, 0.0  ;;  %v4999_v52 = vpop.eup %4998 }
0x17c9   :  { %3196 = vadd.xlane.f32.xlu0 %v3195_v49  ;;  %v3204_v54 = vmul.f32 %v4999_v52, %v4995_v43 }
0x17df   :  { %3281 = vrot.lane.b32.xlu0 %v5438_v13, %s5118_s11 }
0x17e3   :  { %3441 = vrot.lane.b32.xlu0 %v5440_v15, %s5120_s13 }
0x1852   :  { %v3197_v51 = vpop.xlane.xlu0 %3196 }
0x1853   :  { %5000 = vrcp.f32 %v3197_v51 }
0x1856   :  { %v3282_v53 = vpop.permute.xlu0 %3281 }
0x1857   :  { %4809 = vmatpush3.msra.mxu1 %v3282_v53 }
0x1858   :  { %4811 = vmatmul.mubr.msk.f32.vlgmr.msra.gmra.mxu1 %vm171_vm2, %v3204_v54  ;;  %4818 = vmatprep.subr.mxu1 %v5109_v6 }
0x1859   :  { %4819 = vmatpush3.xpose.msk.msra.mxu1 %vm171_vm2, %v3444_v55  ;;  %4820 = vmatprep.mubr.msk.f32.mxu1 %vm5110_vm1, %v5109_v6 }
0x185a   :  { %v3442_v56 = vpop.permute.xlu0 %3441  ;;  %4828 = vmatprep.subr.mxu1 %v5109_v6 }
0x185c   :  { %4821 = vmatmul.mubr.msk.f32.vlgmr.msra.gmra.mxu1 %vm171_vm2, %v3442_v56 }
0x185d   :  { %4830 = vmatprep.mubr.msk.f32.mxu1 %vm5110_vm1, %v5109_v6 }
0x1860   :  { %v5001_v57 = vpop.eup %5000 }
0x1861   :  { %v3202_v58 = vmul.f32 %v5001_v57, %v4997_v48 }
0x1863   :  { %4806 = vmatmul.mubr.msk.f32.vlgmr.msra.gmra.mxu0 %vm171_vm2, %v3202_v58 }
0x1864   :  { %4814 = vmatpush3.msra.mxu0 %v4399_v59 }
0x1865   :  { %4823 = vmatprep.subr.mxu0 %v5109_v6 }
0x1918   :  { %v3353_v5 = vpop.f32.mrf.mxu1 }
0x191a   :  { %v4812_v2 = vpop.f32.mrf.mxu1 }
0x191c   :  { %v3515_v60 = vpop.f32.mrf.mxu1 }
0x191d   :  { %v3597_v61 = vmul.f32 0.35355338, %v3515_v60  ;;  %v4416_v60 = vld [vmem:[%s5683_s3 + $0x30] sm:$0xff] }
0x191e   :  { %v4822_v62 = vpop.f32.mrf.mxu1 }
0x191f   :  { %v3599_v63 = vsel %vm171_vm2, %v3597_v61, -inf  ;;  %v4414_v62 = vld [vmem:[%s5683_s3 + $0x20] sm:$0xff] }
0x1920   :  { %3600 = vmax.xlane.f32.xlu0 %v3599_v63  ;;  %v4428_v63 = vld [vmem:[%s5684_s4 + $0x78] sm:$0xff] }
0x1923   :  { %v3277_v1 = vpop.f32.mrf.mxu0 }
0x1924   :  { %4815 = vmatprep.mubr.msk.f32.mxu0 %vm171_vm2, %v3277_v1  ;;  %v4426_v1 = vld [vmem:[%s5684_s4 + $0x68] sm:$0xff] }
0x1925   :  { %v4807_v3 = vpop.f32.mrf.mxu0  ;;  %4816 = vmatmul.mubr.msk.f32.vlgmr.msra.gmra.mxu0 %vm171_vm2, %v3353_v5 }
0x1926   :  { %4824 = vmatpush3.xpose.msk.msra.mxu0 %vm171_vm2, %v3522_v0  ;;  %4825 = vmatprep.mubr.msk.f32.mxu0 %vm5110_vm1, %v5109_v6  ;;  %v4427_v0 = vld [vmem:[%s5684_s4 + $0x70] sm:$0xff]  ;;  %v4425_v3 = vld [vmem:[%s5684_s4 + $0x60] sm:$0xff] }
0x1927   :  { %4833 = vmatprep.subr.mxu0 %v5109_v6 }
0x1929   :  { %4826 = vmatmul.mubr.msk.f32.vlgmr.msra.gmra.mxu0 %vm171_vm2, %v3520_v4 }
0x192a   :  { %4835 = vmatprep.mubr.msk.f32.mxu0 %vm5110_vm1, %v5109_v6 }
0x19a9   :  { %v3601_v9 = vpop.xlane.xlu0 %3600 }
0x19aa   :  { %v3605_v12 = vsub.f32 %v3597_v61, %v3601_v9  ;;  %v4415_v61 = vld [vmem:[%s5683_s3 + $0x28] sm:$0xff] }
0x19ac   :  { %v3607_v14 = vmul.f32 1.442695, %v3605_v12 }
0x19ae   :  { %5002 = vpow2.f32 %v3607_v14 }
0x19bb   :  { %v5003_v16 = vpop.eup %5002 }
0x19bc   :  { %v3611_v17 = vsel %vm171_vm2, %v5003_v16, 0.0 }
0x19bd   :  { %3612 = vadd.xlane.f32.xlu0 %v3611_v17 }
0x19e5   :  { %v4817_v19 = vpop.f32.mrf.mxu0 }
0x19e6   :  { %v3440_v21 = vadd.f32 %v4817_v19, %v3022_v18  ;;  %v4412_v19 = vld [vmem:[#allocation5 + $0xc] ss:$0 sm:$0xff] }
0x19e7   :  { %v3430_v22 = vpop.f32.mrf.mxu0 }
0x19e8   :  { %v3439_v23 = vadd.f32 %v3430_v22, %v3017_v20 }
0x19e9   :  { %v3593_v24 = vpop.f32.mrf.mxu0 }
0x19ea   :  { %v3598_v25 = vmul.f32 0.35355338, %v3593_v24  ;;  %v4413_v24 = vld [vmem:[#allocation5 + $0xd] ss:$0 sm:$0xff] }
0x19eb   :  { %v4827_v27 = vpop.f32.mrf.mxu0 }
0x19ec   :  { %v3602_v29 = vsel %vm171_vm2, %v3598_v25, -inf }
0x19ed   :  { %3603 = vmax.xlane.f32.xlu1 %v3602_v29 }
0x19fe   :  { %3621 = vrot.lane.b32.xlu1 %v5440_v15, %s5121_s5  ;;  %v4408_v15 = vld [vmem:[%s5682_s2 + $0x38] sm:$0xff] }
0x1a46   :  { %v3613_v30 = vpop.xlane.xlu0 %3612 }
0x1a47   :  { %5004 = vrcp.f32 %v3613_v30  ;;  %v4424_v30 = vld [vmem:[%s5684_s4 + $0x58] sm:$0xff] }
0x1a54   :  { %v5005_v28 = vpop.eup %5004 }
0x1a55   :  { %v3618_v26 = vmul.f32 %v5005_v28, %v5003_v16  ;;  %v4422_v28 = vld [vmem:[%s5684_s4 + $0x48] sm:$0xff] }
0x1a76   :  { %v3604_v31 = vpop.xlane.xlu1 %3603 }
0x1a77   :  { %v3606_v32 = vsub.f32 %v3598_v25, %v3604_v31  ;;  %v4423_v31 = vld [vmem:[%s5684_s4 + $0x50] sm:$0xff] }
0x1a79   :  { %v3609_v10 = vmul.f32 1.442695, %v3606_v32  ;;  %v4421_v32 = vld [vmem:[%s5684_s4 + $0x40] sm:$0xff]  ;;  %s5122_s4 = smov [#allocation8]  }
0x1a7a   :  { %v3622_v33 = vpop.permute.xlu1 %3621  ;;  %s4312_s25 = sshll.u32 %s5122_s4, 4  ;;  %s4313_s25 = int_to_ptr.vmem [resolvable:$true] %s4312_s25 }
0x1a7b   :  { %5006 = vpow2.f32 %v3609_v10  ;;  %4829 = vmatpush3.msra.mxu1 %v3622_v33  ;;  %v4418_v10 = vld [vmem:[#allocation5 + $0xa] ss:$0 sm:$0xff]  ;;  %s5078_s26 = scalar_lea.vmem %s4313_s25, 128  ;;  %p5083_p2 = scmp.lt.s32.totalorder %s4313_s25, %s4313_s25 }
0x1a7c   :  { %4831 = vmatmul.mubr.msk.f32.vlgmr.msra.gmra.mxu1 %vm171_vm2, %v3618_v26  ;;  %4838 = vmatprep.subr.mxu1 %v4408_v15  ;;  %p5079_p1 = scmp.ne.s32.totalorder %s4313_s25, %s5078_s26  ;;  %p5084_p3 = scmp.lt.s32.totalorder %s5078_s26, %s5078_s26 }
0x1a7d   :  { %4839 = vmatpush3.msra.mxu1 %v4408_v15 }
0x1a7e   :  { %4854 = vmatprep.subr.mxu1 %v4428_v63  ;;  %p5085_p4 = por %p5084_p3, %p5083_p2 }
0x1a80   :  { %p5086_p5 = pnand %p5085_p4, %p5079_p1 }
0x1a88   :  { %v5007_v34 = vpop.eup %5006 }
0x1a89   :  { %v3614_v35 = vsel %vm171_vm2, %v5007_v34, 0.0 }
0x1a8a   :  { %3615 = vadd.xlane.f32.xlu0 %v3614_v35 }
0x1aa0   :  { %3697 = vrot.lane.b32.xlu0 %v5438_v13, %s5121_s5 }
0x1b13   :  { %v3616_v36 = vpop.xlane.xlu0 %3615 }
0x1b14   :  { %5008 = vrcp.f32 %v3616_v36 }
0x1b17   :  { %v3698_v37 = vpop.permute.xlu0 %3697 }
0x1b18   :  { %4834 = vmatpush3.msra.mxu0 %v3698_v37  ;;  %v4429_v37 = vld [vmem:[#allocation5 + $0xb] ss:$0 sm:$0xff] }
0x1b21   :  { %v5009_v38 = vpop.eup %5008 }
0x1b22   :  { %v3620_v39 = vmul.f32 %v5009_v38, %v5007_v34 }
0x1b24   :  { %4836 = vmatmul.mubr.msk.f32.vlgmr.msra.gmra.mxu0 %vm171_vm2, %v3620_v39 }
0x1b3c   :  { %v3693_v11 = vpop.f32.mrf.mxu1 }
0x1b3d   :  { %4840 = vmatprep.mubr.msk.f32.mxu1 %vm171_vm2, %v3693_v11 }
0x1b3e   :  { %v4832_v40 = vpop.f32.mrf.mxu1 }
0x1be4   :  { %v3769_v41 = vpop.f32.mrf.mxu0 }
0x1be5   :  { %4841 = vmatmul.mubr.msk.f32.vlgmr.msra.gmra.mxu1 %vm171_vm2, %v3769_v41 }
0x1be6   :  { %v4837_v13 = vpop.f32.mrf.mxu0  ;;  %4855 = vmatpush3.msra.mxu1 %v4428_v63 }
0x1be7   :  { %4856 = vmatprep.subr.mxu1 %v4427_v0 }
0x1be8   :  { %4857 = vmatpush3.msra.mxu1 %v4427_v0 }
0x1be9   :  { %4858 = vmatprep.subr.mxu1 %v4426_v1 }
0x1bea   :  { %4859 = vmatpush3.msra.mxu1 %v4426_v1 }
0x1beb   :  { %4860 = vmatprep.subr.mxu1 %v4425_v3 }
0x1bec   :  { %4861 = vmatpush3.msra.mxu1 %v4425_v3  ;;  %v4433_v3 = vld [vmem:[#allocation5 + $0xf] ss:$0 sm:$0xff] }
0x1bed   :  { %4862 = vmatprep.subr.mxu1 %v4424_v30 }
0x1bee   :  { %4863 = vmatpush3.msra.mxu1 %v4424_v30  ;;  %v4218_v30 = vld [vmem:[#allocation7 + $0xa8] sm:$0xff] }
0x1bef   :  { %4864 = vmatprep.subr.mxu1 %v4423_v31 }
0x1bf0   :  { %4865 = vmatpush3.msra.mxu1 %v4423_v31  ;;  %v4217_v31 = vld [vmem:[#allocation7 + $0xa0] sm:$0xff] }
0x1bf1   :  { %4866 = vmatprep.subr.mxu1 %v4422_v28 }
0x1bf2   :  { %4867 = vmatpush3.msra.mxu1 %v4422_v28  ;;  %v4216_v28 = vld [vmem:[#allocation7 + $0x98] sm:$0xff] }
0x1bf3   :  { %4868 = vmatprep.subr.mxu1 %v4421_v32 }
0x1bf4   :  { %4869 = vmatpush3.msra.mxu1 %v4421_v32  ;;  %v4215_v32 = vld [vmem:[#allocation7 + $0x90] sm:$0xff] }
0x1ca5   :  { %v4842_v43 = vpop.f32.mrf.mxu1 }
0x1ca6   :  { %v3856_v44 = vadd.f32 %v4842_v43, %v3440_v21 }
0x1ca7   :  { %v3846_v45 = vpop.f32.mrf.mxu1 }
0x1ca8   :  { %v3862_v46 = vadd.f32 %v4411_v42, %v3856_v44  ;;  %v3855_v47 = vadd.f32 %v3846_v45, %v3439_v23 }
0x1caa   :  { %v3861_v48 = vadd.f32 %v4411_v42, %v3855_v47  ;;  %v3864_v49 = vadd.f32 %v3862_v46, %v5430_v8 }
0x1cac   :  { %v3868_v50 = vsel %vm86_vm0, %v3864_v49, 0.0  ;;  %v3863_v51 = vadd.f32 %v3861_v48, %v5428_v7  ;;  %v4417_v7 = vld [vmem:[%s5683_s3 + $0x38] sm:$0xff] }
0x1cad   :  { %3869 = vadd.xlane.f32.xlu0 %v3868_v50  ;;  %4843 = vmatprep.subr.mxu0 %v4417_v7 }
0x1cae   :  { %v3865_v52 = vsel %vm86_vm0, %v3863_v51, 0.0  ;;  %4844 = vmatpush3.msra.mxu0 %v4417_v7 }
0x1caf   :  { %3866 = vadd.xlane.f32.xlu1 %v3865_v52  ;;  %4845 = vmatprep.subr.mxu0 %v4416_v60 }
0x1cb0   :  { %4846 = vmatpush3.msra.mxu0 %v4416_v60 }
0x1cb1   :  { %4847 = vmatprep.subr.mxu0 %v4415_v61 }
0x1cb2   :  { %4848 = vmatpush3.msra.mxu0 %v4415_v61  ;;  %v4432_v61 = vld [vmem:[#allocation5 + $0xe] ss:$0 sm:$0xff] }
0x1cb3   :  { %4849 = vmatprep.subr.mxu0 %v4414_v62 }
0x1cb4   :  { %4850 = vmatpush3.msra.mxu0 %v4414_v62 }
0x1cb5   :  { %4873 = vmatprep.subr.mxu0 %v5109_v6 }
0x1d36   :  { %v3870_v53 = vpop.xlane.xlu0 %3869 }
0x1d37   :  { %v3872_v54 = vmul.f32 0.03125, %v3870_v53 }
0x1d38   :  { %v3867_v55 = vpop.xlane.xlu1 %3866 }
0x1d39   :  { %v3874_v56 = vsub.f32 %v3864_v49, %v3872_v54  ;;  %v3871_v57 = vmul.f32 0.03125, %v3867_v55  ;;  %v4134_v54 = vld [vmem:[#allocation7 + $0x18] sm:$0xff]  ;;  %v4133_v55 = vld [vmem:[#allocation7 + $0x10] sm:$0xff] }
0x1d3b   :  { %v3873_v58 = vsub.f32 %v3863_v51, %v3871_v57  ;;  %v3876_v59 = vmul.f32 %v3874_v56, %v3874_v56  ;;  %v4131_v57 = vld [vmem:[#allocation7] sm:$0xff] }
0x1d3d   :  { %v3880_v5 = vsel %vm86_vm0, %v3876_v59, 0.0  ;;  %v3875_v2 = vmul.f32 %v3873_v58, %v3873_v58 }
0x1d3e   :  { %3881 = vadd.xlane.f32.xlu0 %v3880_v5 }
0x1d3f   :  { %v3877_v8 = vsel %vm86_vm0, %v3875_v2, 0.0 }
0x1d40   :  { %3878 = vadd.xlane.f32.xlu1 %v3877_v8 }
0x1dc7   :  { %v3882_v4 = vpop.xlane.xlu0 %3881 }
0x1dc8   :  { %v3884_v9 = vmul.f32 0.03125, %v3882_v4 }
0x1dc9   :  { %v3879_v12 = vpop.xlane.xlu1 %3878 }
0x1dca   :  { %v3886_v14 = vadd.f32 1e-05, %v3884_v9  ;;  %v3883_v16 = vmul.f32 0.03125, %v3879_v12 }
0x1dcc   :  { %5010 = vrsqrt.f32 %v3886_v14  ;;  %v3885_v17 = vadd.f32 1e-05, %v3883_v16 }
0x1dce   :  { %5012 = vrsqrt.f32 %v3885_v17  ;;  %v4229_v17 = vld [vmem:[#allocation7 + $0x100] sm:$0xff] }
0x1dd9   :  { %v5011_v18 = vpop.eup %5010 }
0x1dda   :  { %v3890_v20 = vmul.f32 %v5011_v18, %v3874_v56  ;;  %v4132_v56 = vld [vmem:[#allocation7 + $0x8] sm:$0xff]  ;;  %v4228_v18 = vld [vmem:[#allocation7 + $0xf8] sm:$0xff] }
0x1ddb   :  { %v5013_v21 = vpop.eup %5012 }
0x1ddc   :  { %v3889_v22 = vmul.f32 %v5013_v21, %v3873_v58  ;;  %v3896_v23 = vmul.f32 %v4412_v19, %v3890_v20  ;;  %v4226_v20 = vld [vmem:[#allocation7 + $0xe8] sm:$0xff]  ;;  %v4225_v21 = vld [vmem:[#allocation7 + $0xe0] sm:$0xff] }
0x1dde   :  { %v3895_v25 = vmul.f32 %v4412_v19, %v3889_v22  ;;  %v3902_v29 = vadd.f32 %v4413_v24, %v3896_v23  ;;  %v4227_v19 = vld [vmem:[#allocation7 + $0xf0] sm:$0xff]  ;;  %v4224_v22 = vld [vmem:[#allocation7 + $0xd8] sm:$0xff] }
0x1ddf   :  { %v4223_v23 = vld [vmem:[#allocation7 + $0xd0] sm:$0xff] }
0x1de0   :  { %v3901_v27 = vadd.f32 %v4413_v24, %v3895_v25  ;;  %v4222_v24 = vld [vmem:[#allocation7 + $0xc8] sm:$0xff]  ;;  %v4221_v25 = vld [vmem:[#allocation7 + $0xc0] sm:$0xff] }
0x1de2   :  { %4851 = vmatprep.mubr.msk.f32.mxu0 %vm86_vm0, %v3901_v27 }
0x1de3   :  { %4852 = vmatmul.mubr.msk.f32.vlgmr.msra.gmra.mxu0 %vm86_vm0, %v3902_v29 }
0x1de4   :  { %4881 = vmatprep.mubr.msk.f32.mxu0 %vm5110_vm1, %v5109_v6  ;;  %4874 = vmatpush3.msra.mxu0 %v4134_v54 }
0x1de5   :  { %4875 = vmatprep.subr.mxu0 %v5109_v6 }
0x1de6   :  { %4876 = vmatpush3.msra.mxu0 %v4133_v55 }
0x1de7   :  { %4877 = vmatprep.subr.mxu0 %v5109_v6 }
0x1de8   :  { %4878 = vmatpush3.msra.mxu0 %v4132_v56 }
0x1de9   :  { %4879 = vmatprep.subr.mxu0 %v5109_v6 }
0x1dea   :  { %4880 = vmatpush3.msra.mxu0 %v4131_v57 }
0x1deb   :  { %4884 = vmatprep.subr.mxu0 %v5109_v6 }
0x1ea3   :  { %v4853_v33 = vpop.f32.mrf.mxu0 }
0x1ea4   :  { %v3990_v26 = vadd.f32 %v4853_v33, %v4418_v10  ;;  %v4434_v33 = vld [vmem:[#allocation7 + $0x80] ss:$0 sm:$0xff] }
0x1ea5   :  { %v3984_v34 = vpop.f32.mrf.mxu0 }
0x1ea6   :  { %v3985_v35 = vadd.f32 %v4418_v10, %v3984_v34  ;;  %v3994_v36 = vmax.f32 %v3990_v26, 0.0  ;;  %v4214_v10 = vld [vmem:[#allocation7 + $0x88] sm:$0xff] }
0x1ea8   :  { %v3993_v15 = vmax.f32 %v3985_v35, 0.0 }
0x1eaa   :  { %4870 = vmatprep.mubr.msk.f32.mxu1 %vm1977_vm3, %v3993_v15  ;;  %v4436_v15 = vld [vmem:[#allocation7 + $0x108] ss:$0 sm:$0xff] }
0x1eab   :  { %4871 = vmatmul.mubr.msk.f32.vlgmr.msra.gmra.mxu1 %vm1977_vm3, %v3994_v36 }
0x1f6b   :  { %v4872_v38 = vpop.f32.mrf.mxu1 }
0x1f6c   :  { %v4086_v39 = vadd.f32 %v4872_v38, %v4429_v37 }
0x1f6d   :  { %v4080_v11 = vpop.f32.mrf.mxu1 }
0x1f6e   :  { %v4081_v40 = vadd.f32 %v4429_v37, %v4080_v11  ;;  %v4090_v41 = vadd.f32 %v4086_v39, %v3902_v29  ;;  %v4219_v29 = vld [vmem:[#allocation7 + $0xb0] sm:$0xff] }
0x1f70   :  { %v4094_v13 = vsel %vm86_vm0, %v4090_v41, 0.0  ;;  %v4089_v42 = vadd.f32 %v4081_v40, %v3901_v27  ;;  %v4220_v27 = vld [vmem:[#allocation7 + $0xb8] sm:$0xff] }
0x1f71   :  { %4095 = vadd.xlane.f32.xlu0 %v4094_v13 }
0x1f72   :  { %v4091_v43 = vsel %vm86_vm0, %v4089_v42, 0.0 }
0x1f73   :  { %4092 = vadd.xlane.f32.xlu1 %v4091_v43 }
0x1ffa   :  { %v4096_v44 = vpop.xlane.xlu0 %4095 }
0x1ffb   :  { %v4098_v45 = vmul.f32 0.03125, %v4096_v44 }
0x1ffc   :  { %v4093_v46 = vpop.xlane.xlu1 %4092 }
0x1ffd   :  { %v4100_v47 = vsub.f32 %v4090_v41, %v4098_v45  ;;  %v4097_v48 = vmul.f32 0.03125, %v4093_v46 }
0x1fff   :  { %v4099_v49 = vsub.f32 %v4089_v42, %v4097_v48  ;;  %v4102_v50 = vmul.f32 %v4100_v47, %v4100_v47 }
0x2001   :  { %v4106_v51 = vsel %vm86_vm0, %v4102_v50, 0.0  ;;  %v4101_v52 = vmul.f32 %v4099_v49, %v4099_v49 }
0x2002   :  { %4107 = vadd.xlane.f32.xlu0 %v4106_v51 }
0x2003   :  { %v4103_v53 = vsel %vm86_vm0, %v4101_v52, 0.0 }
0x2004   :  { %4104 = vadd.xlane.f32.xlu1 %v4103_v53 }
0x208b   :  { %v4108_v58 = vpop.xlane.xlu0 %4107 }
0x208c   :  { %v4110_v59 = vmul.f32 0.03125, %v4108_v58 }
0x208d   :  { %v4105_v5 = vpop.xlane.xlu1 %4104 }
0x208e   :  { %v4112_v2 = vadd.f32 1e-05, %v4110_v59  ;;  %v4109_v8 = vmul.f32 0.03125, %v4105_v5 }
0x2090   :  { %5014 = vrsqrt.f32 %v4112_v2  ;;  %v4111_v7 = vadd.f32 1e-05, %v4109_v8 }
0x2092   :  { %5016 = vrsqrt.f32 %v4111_v7 }
0x209d   :  { %v5015_v60 = vpop.eup %5014 }
0x209e   :  { %v4116_v62 = vmul.f32 %v5015_v60, %v4100_v47 }
0x209f   :  { %v5017_v63 = vpop.eup %5016 }
0x20a0   :  { %v4115_v0 = vmul.f32 %v5017_v63, %v4099_v49  ;;  %v4122_v1 = vmul.f32 %v4432_v61, %v4116_v62 }
0x20a2   :  { %v4121_v4 = vmul.f32 %v4432_v61, %v4115_v0  ;;  %v4128_v12 = vadd.f32 %v4433_v3, %v4122_v1 }
0x20a4   :  { %v4127_v9 = vadd.f32 %v4433_v3, %v4121_v4 }
0x20a6   :  { %v4129_v14 = vadd.f32 %v4128_v12, %v4127_v9 }
0x20a8   :  { %v4130_v16 = vmul.f32 0.5, %v4129_v14 }
0x20aa   :  { %4882 = vmatmul.mubr.msk.f32.vlgmr.msra.gmra.mxu0 %vm86_vm0, %v4130_v16 }
0x20ab   :  { %4885 = vmatpush3.msra.mxu0 %v4229_v17  ;;  %4916 = vmatprep.mubr.msk.f32.mxu0 %vm5110_vm1, %v5109_v6 }
0x20ac   :  { %4886 = vmatprep.subr.mxu0 %v5109_v6 }
0x20ad   :  { %4887 = vmatpush3.msra.mxu0 %v4228_v18 }
0x20ae   :  { %4888 = vmatprep.subr.mxu0 %v5109_v6 }
0x20af   :  { %4889 = vmatpush3.msra.mxu0 %v4227_v19 }
0x20b0   :  { %4890 = vmatprep.subr.mxu0 %v5109_v6 }
0x20b1   :  { %4891 = vmatpush3.msra.mxu0 %v4226_v20 }
0x20b2   :  { %4892 = vmatprep.subr.mxu0 %v5109_v6 }
0x20b3   :  { %4893 = vmatpush3.msra.mxu0 %v4225_v21 }
0x20b4   :  { %4894 = vmatprep.subr.mxu0 %v5109_v6 }
0x20b5   :  { %4895 = vmatpush3.msra.mxu0 %v4224_v22 }
0x20b6   :  { %4896 = vmatprep.subr.mxu0 %v5109_v6 }
0x20b7   :  { %4897 = vmatpush3.msra.mxu0 %v4223_v23 }
0x20b8   :  { %4898 = vmatprep.subr.mxu0 %v5109_v6 }
0x20b9   :  { %4899 = vmatpush3.msra.mxu0 %v4222_v24 }
0x20ba   :  { %4900 = vmatprep.subr.mxu0 %v5109_v6 }
0x20bb   :  { %4901 = vmatpush3.msra.mxu0 %v4221_v25 }
0x20bc   :  { %4902 = vmatprep.subr.mxu0 %v5109_v6 }
0x20bd   :  { %4903 = vmatpush3.msra.mxu0 %v4220_v27 }
0x20be   :  { %4904 = vmatprep.subr.mxu0 %v5109_v6 }
0x20bf   :  { %4905 = vmatpush3.msra.mxu0 %v4219_v29 }
0x20c0   :  { %4906 = vmatprep.subr.mxu0 %v5109_v6 }
0x20c1   :  { %4907 = vmatpush3.msra.mxu0 %v4218_v30 }
0x20c2   :  { %4908 = vmatprep.subr.mxu0 %v5109_v6 }
0x20c3   :  { %4909 = vmatpush3.msra.mxu0 %v4217_v31 }
0x20c4   :  { %4910 = vmatprep.subr.mxu0 %v5109_v6 }
0x20c5   :  { %4911 = vmatpush3.msra.mxu0 %v4216_v28 }
0x20c6   :  { %4912 = vmatprep.subr.mxu0 %v5109_v6 }
0x20c7   :  { %4913 = vmatpush3.msra.mxu0 %v4215_v32 }
0x20c8   :  { %4914 = vmatprep.subr.mxu0 %v5109_v6 }
0x20c9   :  { %4915 = vmatpush3.msra.mxu0 %v4214_v10 }
0x216a   :  { %v4209_v26 = vpop.f32.mrf.mxu0 }
0x216b   :  { %v4210_v34 = vadd.f32 %v4434_v33, %v4209_v26 }
0x216c   :  { %v4883_v35 = vpop.f32.mrf.mxu0 }
0x216d   :  { %4917 = vmatmul.mubr.f32.vlgmr.msra.gmra.mxu0 %v4210_v34 }
0x222d   :  { %v4301_v36 = vpop.f32.mrf.mxu0 }
0x222e   :  { %v4302_v37 = vadd.f32 %v4436_v15, %v4301_v36 }
0x222f   :  { %v4918_v38 = vpop.f32.mrf.mxu0 }
0x2230   :  { %4305 = vst [vmem:[#allocation8] sm:$0xff] %v4302_v37 }
0x2231   :  { %5089 = shalt.err (!%p5086_p5)
}
0x2232   :  { %4315 = dma.vmem_to_hbm [thread:$0]  %s4313_s25, 128, %s5687_s7, [#allocation4]  }
0x2233   :  { %5102 = dma.done.wait [#allocation4], 128  }
0x2234   :  { %5103 = vsyncadd [#allocation4], 4294967168 }
0x2235   :  { %4319 = vsyncpa [#allocation3], 1 }
0x2236   :  { %4320 = vsyncpa [#allocation6], 1 }
0x2237   :  { %4321 = vsyncpa [#allocation4], 1 }

</bundles_post_ra>
